<compile_context>
chip_gen: v7x
topology: tpu7x:2x2x1
jax: 0.10.0
libtpu: 0.0.40
codegen_flags: <defaults>
</compile_context>

<pallas_src>
import functools

import jax
import jax.numpy as jnp
from jax import lax
from jax.experimental import pallas as pl
from jax.experimental.pallas import tpu as pltpu


def _lstm_reverse_kernel(x_ref, h0_ref, c0_ref, w_ih_ref, w_hh_ref, b_ref,
                         out_ref, cN_ref,
                         h_scr, c_scr, gx_scr, *, hid_size, chunk):
    t = pl.program_id(0)
    last = pl.num_programs(0) - 1
    H = hid_size
    K = chunk
    B = x_ref.shape[1]
    I = x_ref.shape[2]

    # Initialize recurrent state on the first grid step (which handles times T-1..T-K).
    @pl.when(t == 0)
    def _():
        h_scr[...] = h0_ref[...].astype(jnp.float32)
        c_scr[...] = c0_ref[...].astype(jnp.float32)

    # Input-side GEMM for the whole chunk at once: (K*B, I) @ (I, 4H) + bias.
    # Only the h-side matmul is truly sequential; hoisting this fills the MXU rows.
    x = x_ref[...].reshape(K * B, I)
    gx = jnp.dot(x, w_ih_ref[...], preferred_element_type=jnp.float32) + b_ref[...]
    gx_scr[...] = gx.reshape(K, B, 4 * H)

    w_hh = w_hh_ref[...]                       # load once, reuse across the K steps

    def step(kk, carry):
        h_prev, c_prev = carry                 # f32 (B, H)
        k = K - 1 - kk                         # reverse time order within the chunk
        gates = gx_scr[k] + jnp.dot(h_prev.astype(w_hh.dtype), w_hh,
                                    preferred_element_type=jnp.float32)  # (B, 4H)
        i_g = jax.nn.sigmoid(gates[:, 0 * H:1 * H])
        f_g = jax.nn.sigmoid(gates[:, 1 * H:2 * H])
        g_g = jnp.tanh(gates[:, 2 * H:3 * H])
        o_g = jax.nn.sigmoid(gates[:, 3 * H:4 * H])
        c_new = f_g * c_prev + i_g * g_g
        h_new = o_g * jnp.tanh(c_new)
        out_ref[k] = h_new.astype(out_ref.dtype)
        return h_new, c_new

    h_fin, c_fin = lax.fori_loop(0, K, step, (h_scr[...], c_scr[...]), unroll=True)

    # Carry state to the next chunk.
    h_scr[...] = h_fin
    c_scr[...] = c_fin

    # Final cell state: written exactly once, on the last grid step (time index 0).
    @pl.when(t == last)
    def _():
        cN_ref[...] = c_fin.astype(cN_ref.dtype)


def _pick_chunk(T, target):
    """Largest divisor of T that is <= target (so every chunk is full)."""
    k = max(1, min(T, target))
    while T % k:
        k -= 1
    return k


def reversed_lstm_layer(inp, h0, c0, w_ih, w_hh, b_ih, b_hh, *, chunk=8):
    """Pallas implementation of ReversedLSTMLayer.forward.

    inp: (T, B, I); h0, c0: (B, H); w_ih: (4H, I); w_hh: (4H, H); b_*: (4H,)
    Returns (outputs (T, B, H), (h_final, c_final)).
    """
    T, B, I = inp.shape
    H = h0.shape[1]
    dtype = inp.dtype

    # Keep weights in the caller's dtype (bf16 stays bf16 -> fast MXU path);
    # accumulate in f32 inside the kernel.
    w_ih_t = w_ih.T                                             # (I, 4H)
    w_hh_t = w_hh.T                                             # (H, 4H)
    bias = (b_ih.astype(jnp.float32)
            + b_hh.astype(jnp.float32)).reshape(1, 4 * H)       # (1, 4H)

    K = _pick_chunk(T, chunk)
    nc = T // K

    kernel = functools.partial(_lstm_reverse_kernel, hid_size=H, chunk=K)

    grid_spec = pltpu.PrefetchScalarGridSpec(
        num_scalar_prefetch=0,
        grid=(nc,),
        in_specs=[
            # Chunk of K timesteps, traversed in reverse chunk order.
            pl.BlockSpec((K, B, I), lambda t: (nc - 1 - t, 0, 0)),
            pl.BlockSpec((B, H), lambda t: (0, 0)),              # h0
            pl.BlockSpec((B, H), lambda t: (0, 0)),              # c0
            pl.BlockSpec((I, 4 * H), lambda t: (0, 0)),          # w_ih^T
            pl.BlockSpec((H, 4 * H), lambda t: (0, 0)),          # w_hh^T
            pl.BlockSpec((1, 4 * H), lambda t: (0, 0)),          # bias
        ],
        out_specs=[
            pl.BlockSpec((K, B, H), lambda t: (nc - 1 - t, 0, 0)),  # stacked hiddens
            pl.BlockSpec((B, H), lambda t: (0, 0)),                  # final c
        ],
        scratch_shapes=[
            pltpu.VMEM((B, H), jnp.float32),          # h state (persists across chunks)
            pltpu.VMEM((B, H), jnp.float32),          # c state
            pltpu.VMEM((K, B, 4 * H), jnp.float32),   # precomputed x-side gates
        ],
    )

    outputs, c_final = pl.pallas_call(
        kernel,
        out_shape=(
            jax.ShapeDtypeStruct((T, B, H), dtype),
            jax.ShapeDtypeStruct((B, H), dtype),
        ),
        grid_spec=grid_spec,
        compiler_params=pltpu.CompilerParams(
            dimension_semantics=("arbitrary",),       # sequential recurrence over time
            vmem_limit_bytes=64 * 1024 * 1024,
        ),
    )(inp, h0, c0, w_ih_t, w_hh_t, bias)

    # Final hidden state is exactly the hidden stored at time index 0.
    h_final = outputs[0]
    return outputs, (h_final, c_final)


def _reference(inp, h0, c0, w_ih, w_hh, b_ih, b_hh):
    """Pure-JAX reference of the PyTorch module for validation."""
    T = inp.shape[0]
    H = h0.shape[1]
    hp = jax.lax.Precision.HIGHEST
    h, c = h0.astype(jnp.float32), c0.astype(jnp.float32)
    outs = []
    for i in range(T - 1, -1, -1):
        x = inp[i].astype(jnp.float32)
        gates = (jnp.dot(x, w_ih.T.astype(jnp.float32), precision=hp)
                 + jnp.dot(h, w_hh.T.astype(jnp.float32), precision=hp)
                 + b_ih + b_hh)
        ig = jax.nn.sigmoid(gates[:, 0 * H:1 * H])
        fg = jax.nn.sigmoid(gates[:, 1 * H:2 * H])
        gg = jnp.tanh(gates[:, 2 * H:3 * H])
        og = jax.nn.sigmoid(gates[:, 3 * H:4 * H])
        c = fg * c + ig * gg
        h = og * jnp.tanh(c)
        outs.append(h)
    return jnp.stack(outs[::-1]), (h, c)


if __name__ == "__main__":
    # Small, lane-aligned shapes consistent with the module's forward: inp (T, B, I).
    T, B, I, H = 16, 8, 128, 128
    key = jax.random.PRNGKey(0)
    k_x, k_h, k_c, k_wi, k_wh, k_bi, k_bh = jax.random.split(key, 7)

    inp = jax.random.normal(k_x, (T, B, I), jnp.float32)

    # The PyTorch forward xavier_normal_-initializes (B, H) hidden/cell each call;
    # we do the same deterministically here.
    xav_std = (2.0 / (B + H)) ** 0.5
    h0 = xav_std * jax.random.normal(k_h, (B, H), jnp.float32)
    c0 = xav_std * jax.random.normal(k_c, (B, H), jnp.float32)

    # LSTMCell parameters (PyTorch shapes): uniform(-1/sqrt(H), 1/sqrt(H)).
    bound = 1.0 / (H ** 0.5)
    w_ih = jax.random.uniform(k_wi, (4 * H, I), jnp.float32, -bound, bound)
    w_hh = jax.random.uniform(k_wh, (4 * H, H), jnp.float32, -bound, bound)
    b_ih = jax.random.uniform(k_bi, (4 * H,), jnp.float32, -bound, bound)
    b_hh = jax.random.uniform(k_bh, (4 * H,), jnp.float32, -bound, bound)

    outputs, (h_fin, c_fin) = reversed_lstm_layer(inp, h0, c0, w_ih, w_hh, b_ih, b_hh)
    jax.block_until_ready((outputs, h_fin, c_fin))

    ref_out, (ref_h, ref_c) = _reference(inp, h0, c0, w_ih, w_hh, b_ih, b_hh)
    assert jnp.allclose(outputs, ref_out, atol=1e-3, rtol=1e-3), \
        float(jnp.max(jnp.abs(outputs - ref_out)))
    assert jnp.allclose(h_fin, ref_h, atol=1e-3, rtol=1e-3)
    assert jnp.allclose(c_fin, ref_c, atol=1e-3, rtol=1e-3)

    print("KERNEL_OK")
</pallas_src>

<mosaic_0001>
module attributes {stable_mosaic.version = 11 : i64} {
  func.func @_lstm_reverse_kernel(%arg0: i32, %arg1: memref<8x8x128xf32, #tpu.memory_space<vmem>>, %arg2: memref<8x128xf32, #tpu.memory_space<vmem>>, %arg3: memref<8x128xf32, #tpu.memory_space<vmem>>, %arg4: memref<128x512xf32, #tpu.memory_space<vmem>>, %arg5: memref<128x512xf32, #tpu.memory_space<vmem>>, %arg6: memref<1x512xf32, #tpu.memory_space<vmem>>, %arg7: memref<8x8x128xf32, #tpu.memory_space<vmem>>, %arg8: memref<8x128xf32, #tpu.memory_space<vmem>>, %arg9: memref<8x128xf32, #tpu.memory_space<vmem>>, %arg10: memref<8x128xf32, #tpu.memory_space<vmem>>, %arg11: memref<8x8x512xf32, #tpu.memory_space<vmem>>) attributes {dimension_semantics = [#tpu.dimension_semantics<arbitrary>], iteration_bounds = array<i64: 2>, scalar_prefetch = 0 : i64, scratch_operands = 3 : i64, tpu.core_type = #tpu.core_type<tc>, window_params = [{transform_indices = @transform_0, window_bounds = array<i64: 8, 8, 128>}, {pipeline_mode = #tpu.pipeline_mode<synchronous>, transform_indices = @transform_1, window_bounds = array<i64: 8, 128>}, {pipeline_mode = #tpu.pipeline_mode<synchronous>, transform_indices = @transform_2, window_bounds = array<i64: 8, 128>}, {pipeline_mode = #tpu.pipeline_mode<synchronous>, transform_indices = @transform_3, window_bounds = array<i64: 128, 512>}, {pipeline_mode = #tpu.pipeline_mode<synchronous>, transform_indices = @transform_4, window_bounds = array<i64: 128, 512>}, {pipeline_mode = #tpu.pipeline_mode<synchronous>, transform_indices = @transform_5, window_bounds = array<i64: 1, 512>}, {transform_indices = @transform_6, window_bounds = array<i64: 8, 8, 128>}, {pipeline_mode = #tpu.pipeline_mode<synchronous>, transform_indices = @transform_7, window_bounds = array<i64: 8, 128>}]} {
    %c0_i32 = arith.constant 0 : i32
    %0 = arith.cmpi eq, %arg0, %c0_i32 : i32
    %1 = arith.extui %0 : i1 to i32
    %c0_i32_0 = arith.constant 0 : i32
    %2 = arith.cmpi ne, %1, %c0_i32_0 : i32
    scf.if %2 {
      %c0_95 = arith.constant 0 : index
      %c0_96 = arith.constant 0 : index
      %300 = vector.load %arg2[%c0_95, %c0_96] : memref<8x128xf32, #tpu.memory_space<vmem>>, vector<8x128xf32>
      %c0_97 = arith.constant 0 : index
      %c0_98 = arith.constant 0 : index
      %301 = vector.load %arg9[%c0_97, %c0_98] : memref<8x128xf32, #tpu.memory_space<vmem>>, vector<8x128xf32>
      tpu.vector_store %arg9[%c0_97, %c0_98], %300 {strides = array<i32>} : memref<8x128xf32, #tpu.memory_space<vmem>>, vector<8x128xf32>,
      %c0_99 = arith.constant 0 : index
      %c0_100 = arith.constant 0 : index
      %302 = vector.load %arg3[%c0_99, %c0_100] : memref<8x128xf32, #tpu.memory_space<vmem>>, vector<8x128xf32>
      %c0_101 = arith.constant 0 : index
      %c0_102 = arith.constant 0 : index
      %303 = vector.load %arg10[%c0_101, %c0_102] : memref<8x128xf32, #tpu.memory_space<vmem>>, vector<8x128xf32>
      tpu.vector_store %arg10[%c0_101, %c0_102], %302 {strides = array<i32>} : memref<8x128xf32, #tpu.memory_space<vmem>>, vector<8x128xf32>,
    } else {
    }
    %c0 = arith.constant 0 : index
    %c0_1 = arith.constant 0 : index
    %c0_2 = arith.constant 0 : index
    %3 = vector.load %arg1[%c0, %c0_1, %c0_2] : memref<8x8x128xf32, #tpu.memory_space<vmem>>, vector<8x8x128xf32>
    %4 = vector.shape_cast %3 : vector<8x8x128xf32> to vector<64x128xf32>
    %c0_3 = arith.constant 0 : index
    %c0_4 = arith.constant 0 : index
    %5 = vector.load %arg4[%c0_3, %c0_4] : memref<128x512xf32, #tpu.memory_space<vmem>>, vector<128x512xf32>
    %cst = arith.constant dense<0.000000e+00> : vector<64x512xf32>
    %6 = tpu.matmul %4, %5, %cst {dimension_numbers = #tpu.dot_dimension_numbers<[1], [0], [0], [1], [0, 0, 1, 1], [], []>} : vector<64x128xf32>, vector<128x512xf32>, vector<64x512xf32> -> vector<64x512xf32>
    %c0_5 = arith.constant 0 : index
    %c0_6 = arith.constant 0 : index
    %7 = vector.load %arg6[%c0_5, %c0_6] : memref<1x512xf32, #tpu.memory_space<vmem>>, vector<1x512xf32>
    %8 = vector.broadcast %7 : vector<1x512xf32> to vector<64x512xf32>
    %9 = arith.addf %6, %8 : vector<64x512xf32>
    %10 = vector.shape_cast %9 : vector<64x512xf32> to vector<8x8x512xf32>
    %c0_7 = arith.constant 0 : index
    %c0_8 = arith.constant 0 : index
    %c0_9 = arith.constant 0 : index
    %11 = vector.load %arg11[%c0_7, %c0_8, %c0_9] : memref<8x8x512xf32, #tpu.memory_space<vmem>>, vector<8x8x512xf32>
    tpu.vector_store %arg11[%c0_7, %c0_8, %c0_9], %10 {strides = array<i32>} : memref<8x8x512xf32, #tpu.memory_space<vmem>>, vector<8x8x512xf32>,
    %c0_10 = arith.constant 0 : index
    %c0_11 = arith.constant 0 : index
    %12 = vector.load %arg5[%c0_10, %c0_11] : memref<128x512xf32, #tpu.memory_space<vmem>>, vector<128x512xf32>
    %c0_12 = arith.constant 0 : index
    %c0_13 = arith.constant 0 : index
    %13 = vector.load %arg9[%c0_12, %c0_13] : memref<8x128xf32, #tpu.memory_space<vmem>>, vector<8x128xf32>
    %c0_14 = arith.constant 0 : index
    %c0_15 = arith.constant 0 : index
    %14 = vector.load %arg10[%c0_14, %c0_15] : memref<8x128xf32, #tpu.memory_space<vmem>>, vector<8x128xf32>
    %c0_i32_16 = arith.constant 0 : i32
    %c7_i32 = arith.constant 7 : i32
    %15 = arith.subi %c7_i32, %c0_i32_16 : i32
    %16 = arith.index_cast %15 : i32 to index
    %c0_17 = arith.constant 0 : index
    %c0_18 = arith.constant 0 : index
    %17 = vector.load %arg11[%16, %c0_17, %c0_18] : memref<8x8x512xf32, #tpu.memory_space<vmem>>, vector<1x8x512xf32>
    %18 = vector.shape_cast %17 : vector<1x8x512xf32> to vector<8x512xf32>
    %cst_19 = arith.constant dense<0.000000e+00> : vector<8x512xf32>
    %19 = tpu.matmul %13, %12, %cst_19 {dimension_numbers = #tpu.dot_dimension_numbers<[1], [0], [0], [1], [0, 0, 1, 1], [], []>} : vector<8x128xf32>, vector<128x512xf32>, vector<8x512xf32> -> vector<8x512xf32>
    %20 = arith.addf %18, %19 : vector<8x512xf32>
    %21 = vector.extract_strided_slice %20 {offsets = [0, 0], sizes = [8, 128], strides = [1, 1]} : vector<8x512xf32> to vector<8x128xf32>
    %22 = arith.negf %21 : vector<8x128xf32>
    %23 = math.exp %22 : vector<8x128xf32>
    %cst_20 = arith.constant 1.000000e+00 : f32
    %24 = vector.broadcast %cst_20 : f32 to vector<8x128xf32>
    %25 = arith.addf %24, %23 : vector<8x128xf32>
    %26 = arith.divf %24, %25 : vector<8x128xf32>
    %27 = vector.extract_strided_slice %20 {offsets = [0, 128], sizes = [8, 128], strides = [1, 1]} : vector<8x512xf32> to vector<8x128xf32>
    %28 = arith.negf %27 : vector<8x128xf32>
    %29 = math.exp %28 : vector<8x128xf32>
    %cst_21 = arith.constant 1.000000e+00 : f32
    %30 = vector.broadcast %cst_21 : f32 to vector<8x128xf32>
    %31 = arith.addf %30, %29 : vector<8x128xf32>
    %32 = arith.divf %30, %31 : vector<8x128xf32>
    %33 = vector.extract_strided_slice %20 {offsets = [0, 256], sizes = [8, 128], strides = [1, 1]} : vector<8x512xf32> to vector<8x128xf32>
    %34 = math.tanh %33 : vector<8x128xf32>
    %35 = vector.extract_strided_slice %20 {offsets = [0, 384], sizes = [8, 128], strides = [1, 1]} : vector<8x512xf32> to vector<8x128xf32>
    %36 = arith.negf %35 : vector<8x128xf32>
    %37 = math.exp %36 : vector<8x128xf32>
    %cst_22 = arith.constant 1.000000e+00 : f32
    %38 = vector.broadcast %cst_22 : f32 to vector<8x128xf32>
    %39 = arith.addf %38, %37 : vector<8x128xf32>
    %40 = arith.divf %38, %39 : vector<8x128xf32>
    %41 = arith.mulf %32, %14 : vector<8x128xf32>
    %42 = arith.mulf %26, %34 : vector<8x128xf32>
    %43 = arith.addf %41, %42 : vector<8x128xf32>
    %44 = math.tanh %43 : vector<8x128xf32>
    %45 = arith.mulf %40, %44 : vector<8x128xf32>
    %46 = arith.index_cast %15 : i32 to index
    %c0_23 = arith.constant 0 : index
    %c0_24 = arith.constant 0 : index
    %47 = vector.load %arg7[%46, %c0_23, %c0_24] : memref<8x8x128xf32, #tpu.memory_space<vmem>>, vector<1x8x128xf32>
    %48 = vector.shape_cast %47 : vector<1x8x128xf32> to vector<8x128xf32>
    %49 = vector.shape_cast %45 : vector<8x128xf32> to vector<1x8x128xf32>
    tpu.vector_store %arg7[%46, %c0_23, %c0_24], %49 {strides = array<i32>} : memref<8x8x128xf32, #tpu.memory_space<vmem>>, vector<1x8x128xf32>,
    %c1_i32 = arith.constant 1 : i32
    %c7_i32_25 = arith.constant 7 : i32
    %50 = arith.subi %c7_i32_25, %c1_i32 : i32
    %51 = arith.index_cast %50 : i32 to index
    %c0_26 = arith.constant 0 : index
    %c0_27 = arith.constant 0 : index
    %52 = vector.load %arg11[%51, %c0_26, %c0_27] : memref<8x8x512xf32, #tpu.memory_space<vmem>>, vector<1x8x512xf32>
    %53 = vector.shape_cast %52 : vector<1x8x512xf32> to vector<8x512xf32>
    %cst_28 = arith.constant dense<0.000000e+00> : vector<8x512xf32>
    %54 = tpu.matmul %45, %12, %cst_28 {dimension_numbers = #tpu.dot_dimension_numbers<[1], [0], [0], [1], [0, 0, 1, 1], [], []>} : vector<8x128xf32>, vector<128x512xf32>, vector<8x512xf32> -> vector<8x512xf32>
    %55 = arith.addf %53, %54 : vector<8x512xf32>
    %56 = vector.extract_strided_slice %55 {offsets = [0, 0], sizes = [8, 128], strides = [1, 1]} : vector<8x512xf32> to vector<8x128xf32>
    %57 = arith.negf %56 : vector<8x128xf32>
    %58 = math.exp %57 : vector<8x128xf32>
    %cst_29 = arith.constant 1.000000e+00 : f32
    %59 = vector.broadcast %cst_29 : f32 to vector<8x128xf32>
    %60 = arith.addf %59, %58 : vector<8x128xf32>
    %61 = arith.divf %59, %60 : vector<8x128xf32>
    %62 = vector.extract_strided_slice %55 {offsets = [0, 128], sizes = [8, 128], strides = [1, 1]} : vector<8x512xf32> to vector<8x128xf32>
    %63 = arith.negf %62 : vector<8x128xf32>
    %64 = math.exp %63 : vector<8x128xf32>
    %cst_30 = arith.constant 1.000000e+00 : f32
    %65 = vector.broadcast %cst_30 : f32 to vector<8x128xf32>
    %66 = arith.addf %65, %64 : vector<8x128xf32>
    %67 = arith.divf %65, %66 : vector<8x128xf32>
    %68 = vector.extract_strided_slice %55 {offsets = [0, 256], sizes = [8, 128], strides = [1, 1]} : vector<8x512xf32> to vector<8x128xf32>
    %69 = math.tanh %68 : vector<8x128xf32>
    %70 = vector.extract_strided_slice %55 {offsets = [0, 384], sizes = [8, 128], strides = [1, 1]} : vector<8x512xf32> to vector<8x128xf32>
    %71 = arith.negf %70 : vector<8x128xf32>
    %72 = math.exp %71 : vector<8x128xf32>
    %cst_31 = arith.constant 1.000000e+00 : f32
    %73 = vector.broadcast %cst_31 : f32 to vector<8x128xf32>
    %74 = arith.addf %73, %72 : vector<8x128xf32>
    %75 = arith.divf %73, %74 : vector<8x128xf32>
    %76 = arith.mulf %67, %43 : vector<8x128xf32>
    %77 = arith.mulf %61, %69 : vector<8x128xf32>
    %78 = arith.addf %76, %77 : vector<8x128xf32>
    %79 = math.tanh %78 : vector<8x128xf32>
    %80 = arith.mulf %75, %79 : vector<8x128xf32>
    %81 = arith.index_cast %50 : i32 to index
    %c0_32 = arith.constant 0 : index
    %c0_33 = arith.constant 0 : index
    %82 = vector.load %arg7[%81, %c0_32, %c0_33] : memref<8x8x128xf32, #tpu.memory_space<vmem>>, vector<1x8x128xf32>
    %83 = vector.shape_cast %82 : vector<1x8x128xf32> to vector<8x128xf32>
    %84 = vector.shape_cast %80 : vector<8x128xf32> to vector<1x8x128xf32>
    tpu.vector_store %arg7[%81, %c0_32, %c0_33], %84 {strides = array<i32>} : memref<8x8x128xf32, #tpu.memory_space<vmem>>, vector<1x8x128xf32>,
    %c2_i32 = arith.constant 2 : i32
    %c7_i32_34 = arith.constant 7 : i32
    %85 = arith.subi %c7_i32_34, %c2_i32 : i32
    %86 = arith.index_cast %85 : i32 to index
    %c0_35 = arith.constant 0 : index
    %c0_36 = arith.constant 0 : index
    %87 = vector.load %arg11[%86, %c0_35, %c0_36] : memref<8x8x512xf32, #tpu.memory_space<vmem>>, vector<1x8x512xf32>
    %88 = vector.shape_cast %87 : vector<1x8x512xf32> to vector<8x512xf32>
    %cst_37 = arith.constant dense<0.000000e+00> : vector<8x512xf32>
    %89 = tpu.matmul %80, %12, %cst_37 {dimension_numbers = #tpu.dot_dimension_numbers<[1], [0], [0], [1], [0, 0, 1, 1], [], []>} : vector<8x128xf32>, vector<128x512xf32>, vector<8x512xf32> -> vector<8x512xf32>
    %90 = arith.addf %88, %89 : vector<8x512xf32>
    %91 = vector.extract_strided_slice %90 {offsets = [0, 0], sizes = [8, 128], strides = [1, 1]} : vector<8x512xf32> to vector<8x128xf32>
    %92 = arith.negf %91 : vector<8x128xf32>
    %93 = math.exp %92 : vector<8x128xf32>
    %cst_38 = arith.constant 1.000000e+00 : f32
    %94 = vector.broadcast %cst_38 : f32 to vector<8x128xf32>
    %95 = arith.addf %94, %93 : vector<8x128xf32>
    %96 = arith.divf %94, %95 : vector<8x128xf32>
    %97 = vector.extract_strided_slice %90 {offsets = [0, 128], sizes = [8, 128], strides = [1, 1]} : vector<8x512xf32> to vector<8x128xf32>
    %98 = arith.negf %97 : vector<8x128xf32>
    %99 = math.exp %98 : vector<8x128xf32>
    %cst_39 = arith.constant 1.000000e+00 : f32
    %100 = vector.broadcast %cst_39 : f32 to vector<8x128xf32>
    %101 = arith.addf %100, %99 : vector<8x128xf32>
    %102 = arith.divf %100, %101 : vector<8x128xf32>
    %103 = vector.extract_strided_slice %90 {offsets = [0, 256], sizes = [8, 128], strides = [1, 1]} : vector<8x512xf32> to vector<8x128xf32>
    %104 = math.tanh %103 : vector<8x128xf32>
    %105 = vector.extract_strided_slice %90 {offsets = [0, 384], sizes = [8, 128], strides = [1, 1]} : vector<8x512xf32> to vector<8x128xf32>
    %106 = arith.negf %105 : vector<8x128xf32>
    %107 = math.exp %106 : vector<8x128xf32>
    %cst_40 = arith.constant 1.000000e+00 : f32
    %108 = vector.broadcast %cst_40 : f32 to vector<8x128xf32>
    %109 = arith.addf %108, %107 : vector<8x128xf32>
    %110 = arith.divf %108, %109 : vector<8x128xf32>
    %111 = arith.mulf %102, %78 : vector<8x128xf32>
    %112 = arith.mulf %96, %104 : vector<8x128xf32>
    %113 = arith.addf %111, %112 : vector<8x128xf32>
    %114 = math.tanh %113 : vector<8x128xf32>
    %115 = arith.mulf %110, %114 : vector<8x128xf32>
    %116 = arith.index_cast %85 : i32 to index
    %c0_41 = arith.constant 0 : index
    %c0_42 = arith.constant 0 : index
    %117 = vector.load %arg7[%116, %c0_41, %c0_42] : memref<8x8x128xf32, #tpu.memory_space<vmem>>, vector<1x8x128xf32>
    %118 = vector.shape_cast %117 : vector<1x8x128xf32> to vector<8x128xf32>
    %119 = vector.shape_cast %115 : vector<8x128xf32> to vector<1x8x128xf32>
    tpu.vector_store %arg7[%116, %c0_41, %c0_42], %119 {strides = array<i32>} : memref<8x8x128xf32, #tpu.memory_space<vmem>>, vector<1x8x128xf32>,
    %c3_i32 = arith.constant 3 : i32
    %c7_i32_43 = arith.constant 7 : i32
    %120 = arith.subi %c7_i32_43, %c3_i32 : i32
    %121 = arith.index_cast %120 : i32 to index
    %c0_44 = arith.constant 0 : index
    %c0_45 = arith.constant 0 : index
    %122 = vector.load %arg11[%121, %c0_44, %c0_45] : memref<8x8x512xf32, #tpu.memory_space<vmem>>, vector<1x8x512xf32>
    %123 = vector.shape_cast %122 : vector<1x8x512xf32> to vector<8x512xf32>
    %cst_46 = arith.constant dense<0.000000e+00> : vector<8x512xf32>
    %124 = tpu.matmul %115, %12, %cst_46 {dimension_numbers = #tpu.dot_dimension_numbers<[1], [0], [0], [1], [0, 0, 1, 1], [], []>} : vector<8x128xf32>, vector<128x512xf32>, vector<8x512xf32> -> vector<8x512xf32>
    %125 = arith.addf %123, %124 : vector<8x512xf32>
    %126 = vector.extract_strided_slice %125 {offsets = [0, 0], sizes = [8, 128], strides = [1, 1]} : vector<8x512xf32> to vector<8x128xf32>
    %127 = arith.negf %126 : vector<8x128xf32>
    %128 = math.exp %127 : vector<8x128xf32>
    %cst_47 = arith.constant 1.000000e+00 : f32
    %129 = vector.broadcast %cst_47 : f32 to vector<8x128xf32>
    %130 = arith.addf %129, %128 : vector<8x128xf32>
    %131 = arith.divf %129, %130 : vector<8x128xf32>
    %132 = vector.extract_strided_slice %125 {offsets = [0, 128], sizes = [8, 128], strides = [1, 1]} : vector<8x512xf32> to vector<8x128xf32>
    %133 = arith.negf %132 : vector<8x128xf32>
    %134 = math.exp %133 : vector<8x128xf32>
    %cst_48 = arith.constant 1.000000e+00 : f32
    %135 = vector.broadcast %cst_48 : f32 to vector<8x128xf32>
    %136 = arith.addf %135, %134 : vector<8x128xf32>
    %137 = arith.divf %135, %136 : vector<8x128xf32>
    %138 = vector.extract_strided_slice %125 {offsets = [0, 256], sizes = [8, 128], strides = [1, 1]} : vector<8x512xf32> to vector<8x128xf32>
    %139 = math.tanh %138 : vector<8x128xf32>
    %140 = vector.extract_strided_slice %125 {offsets = [0, 384], sizes = [8, 128], strides = [1, 1]} : vector<8x512xf32> to vector<8x128xf32>
    %141 = arith.negf %140 : vector<8x128xf32>
    %142 = math.exp %141 : vector<8x128xf32>
    %cst_49 = arith.constant 1.000000e+00 : f32
    %143 = vector.broadcast %cst_49 : f32 to vector<8x128xf32>
    %144 = arith.addf %143, %142 : vector<8x128xf32>
    %145 = arith.divf %143, %144 : vector<8x128xf32>
    %146 = arith.mulf %137, %113 : vector<8x128xf32>
    %147 = arith.mulf %131, %139 : vector<8x128xf32>
    %148 = arith.addf %146, %147 : vector<8x128xf32>
    %149 = math.tanh %148 : vector<8x128xf32>
    %150 = arith.mulf %145, %149 : vector<8x128xf32>
    %151 = arith.index_cast %120 : i32 to index
    %c0_50 = arith.constant 0 : index
    %c0_51 = arith.constant 0 : index
    %152 = vector.load %arg7[%151, %c0_50, %c0_51] : memref<8x8x128xf32, #tpu.memory_space<vmem>>, vector<1x8x128xf32>
    %153 = vector.shape_cast %152 : vector<1x8x128xf32> to vector<8x128xf32>
    %154 = vector.shape_cast %150 : vector<8x128xf32> to vector<1x8x128xf32>
    tpu.vector_store %arg7[%151, %c0_50, %c0_51], %154 {strides = array<i32>} : memref<8x8x128xf32, #tpu.memory_space<vmem>>, vector<1x8x128xf32>,
    %c4_i32 = arith.constant 4 : i32
    %c7_i32_52 = arith.constant 7 : i32
    %155 = arith.subi %c7_i32_52, %c4_i32 : i32
    %156 = arith.index_cast %155 : i32 to index
    %c0_53 = arith.constant 0 : index
    %c0_54 = arith.constant 0 : index
    %157 = vector.load %arg11[%156, %c0_53, %c0_54] : memref<8x8x512xf32, #tpu.memory_space<vmem>>, vector<1x8x512xf32>
    %158 = vector.shape_cast %157 : vector<1x8x512xf32> to vector<8x512xf32>
    %cst_55 = arith.constant dense<0.000000e+00> : vector<8x512xf32>
    %159 = tpu.matmul %150, %12, %cst_55 {dimension_numbers = #tpu.dot_dimension_numbers<[1], [0], [0], [1], [0, 0, 1, 1], [], []>} : vector<8x128xf32>, vector<128x512xf32>, vector<8x512xf32> -> vector<8x512xf32>
    %160 = arith.addf %158, %159 : vector<8x512xf32>
    %161 = vector.extract_strided_slice %160 {offsets = [0, 0], sizes = [8, 128], strides = [1, 1]} : vector<8x512xf32> to vector<8x128xf32>
    %162 = arith.negf %161 : vector<8x128xf32>
    %163 = math.exp %162 : vector<8x128xf32>
    %cst_56 = arith.constant 1.000000e+00 : f32
    %164 = vector.broadcast %cst_56 : f32 to vector<8x128xf32>
    %165 = arith.addf %164, %163 : vector<8x128xf32>
    %166 = arith.divf %164, %165 : vector<8x128xf32>
    %167 = vector.extract_strided_slice %160 {offsets = [0, 128], sizes = [8, 128], strides = [1, 1]} : vector<8x512xf32> to vector<8x128xf32>
    %168 = arith.negf %167 : vector<8x128xf32>
    %169 = math.exp %168 : vector<8x128xf32>
    %cst_57 = arith.constant 1.000000e+00 : f32
    %170 = vector.broadcast %cst_57 : f32 to vector<8x128xf32>
    %171 = arith.addf %170, %169 : vector<8x128xf32>
    %172 = arith.divf %170, %171 : vector<8x128xf32>
    %173 = vector.extract_strided_slice %160 {offsets = [0, 256], sizes = [8, 128], strides = [1, 1]} : vector<8x512xf32> to vector<8x128xf32>
    %174 = math.tanh %173 : vector<8x128xf32>
    %175 = vector.extract_strided_slice %160 {offsets = [0, 384], sizes = [8, 128], strides = [1, 1]} : vector<8x512xf32> to vector<8x128xf32>
    %176 = arith.negf %175 : vector<8x128xf32>
    %177 = math.exp %176 : vector<8x128xf32>
    %cst_58 = arith.constant 1.000000e+00 : f32
    %178 = vector.broadcast %cst_58 : f32 to vector<8x128xf32>
    %179 = arith.addf %178, %177 : vector<8x128xf32>
    %180 = arith.divf %178, %179 : vector<8x128xf32>
    %181 = arith.mulf %172, %148 : vector<8x128xf32>
    %182 = arith.mulf %166, %174 : vector<8x128xf32>
    %183 = arith.addf %181, %182 : vector<8x128xf32>
    %184 = math.tanh %183 : vector<8x128xf32>
    %185 = arith.mulf %180, %184 : vector<8x128xf32>
    %186 = arith.index_cast %155 : i32 to index
    %c0_59 = arith.constant 0 : index
    %c0_60 = arith.constant 0 : index
    %187 = vector.load %arg7[%186, %c0_59, %c0_60] : memref<8x8x128xf32, #tpu.memory_space<vmem>>, vector<1x8x128xf32>
    %188 = vector.shape_cast %187 : vector<1x8x128xf32> to vector<8x128xf32>
    %189 = vector.shape_cast %185 : vector<8x128xf32> to vector<1x8x128xf32>
    tpu.vector_store %arg7[%186, %c0_59, %c0_60], %189 {strides = array<i32>} : memref<8x8x128xf32, #tpu.memory_space<vmem>>, vector<1x8x128xf32>,
    %c5_i32 = arith.constant 5 : i32
    %c7_i32_61 = arith.constant 7 : i32
    %190 = arith.subi %c7_i32_61, %c5_i32 : i32
    %191 = arith.index_cast %190 : i32 to index
    %c0_62 = arith.constant 0 : index
    %c0_63 = arith.constant 0 : index
    %192 = vector.load %arg11[%191, %c0_62, %c0_63] : memref<8x8x512xf32, #tpu.memory_space<vmem>>, vector<1x8x512xf32>
    %193 = vector.shape_cast %192 : vector<1x8x512xf32> to vector<8x512xf32>
    %cst_64 = arith.constant dense<0.000000e+00> : vector<8x512xf32>
    %194 = tpu.matmul %185, %12, %cst_64 {dimension_numbers = #tpu.dot_dimension_numbers<[1], [0], [0], [1], [0, 0, 1, 1], [], []>} : vector<8x128xf32>, vector<128x512xf32>, vector<8x512xf32> -> vector<8x512xf32>
    %195 = arith.addf %193, %194 : vector<8x512xf32>
    %196 = vector.extract_strided_slice %195 {offsets = [0, 0], sizes = [8, 128], strides = [1, 1]} : vector<8x512xf32> to vector<8x128xf32>
    %197 = arith.negf %196 : vector<8x128xf32>
    %198 = math.exp %197 : vector<8x128xf32>
    %cst_65 = arith.constant 1.000000e+00 : f32
    %199 = vector.broadcast %cst_65 : f32 to vector<8x128xf32>
    %200 = arith.addf %199, %198 : vector<8x128xf32>
    %201 = arith.divf %199, %200 : vector<8x128xf32>
    %202 = vector.extract_strided_slice %195 {offsets = [0, 128], sizes = [8, 128], strides = [1, 1]} : vector<8x512xf32> to vector<8x128xf32>
    %203 = arith.negf %202 : vector<8x128xf32>
    %204 = math.exp %203 : vector<8x128xf32>
    %cst_66 = arith.constant 1.000000e+00 : f32
    %205 = vector.broadcast %cst_66 : f32 to vector<8x128xf32>
    %206 = arith.addf %205, %204 : vector<8x128xf32>
    %207 = arith.divf %205, %206 : vector<8x128xf32>
    %208 = vector.extract_strided_slice %195 {offsets = [0, 256], sizes = [8, 128], strides = [1, 1]} : vector<8x512xf32> to vector<8x128xf32>
    %209 = math.tanh %208 : vector<8x128xf32>
    %210 = vector.extract_strided_slice %195 {offsets = [0, 384], sizes = [8, 128], strides = [1, 1]} : vector<8x512xf32> to vector<8x128xf32>
    %211 = arith.negf %210 : vector<8x128xf32>
    %212 = math.exp %211 : vector<8x128xf32>
    %cst_67 = arith.constant 1.000000e+00 : f32
    %213 = vector.broadcast %cst_67 : f32 to vector<8x128xf32>
    %214 = arith.addf %213, %212 : vector<8x128xf32>
    %215 = arith.divf %213, %214 : vector<8x128xf32>
    %216 = arith.mulf %207, %183 : vector<8x128xf32>
    %217 = arith.mulf %201, %209 : vector<8x128xf32>
    %218 = arith.addf %216, %217 : vector<8x128xf32>
    %219 = math.tanh %218 : vector<8x128xf32>
    %220 = arith.mulf %215, %219 : vector<8x128xf32>
    %221 = arith.index_cast %190 : i32 to index
    %c0_68 = arith.constant 0 : index
    %c0_69 = arith.constant 0 : index
    %222 = vector.load %arg7[%221, %c0_68, %c0_69] : memref<8x8x128xf32, #tpu.memory_space<vmem>>, vector<1x8x128xf32>
    %223 = vector.shape_cast %222 : vector<1x8x128xf32> to vector<8x128xf32>
    %224 = vector.shape_cast %220 : vector<8x128xf32> to vector<1x8x128xf32>
    tpu.vector_store %arg7[%221, %c0_68, %c0_69], %224 {strides = array<i32>} : memref<8x8x128xf32, #tpu.memory_space<vmem>>, vector<1x8x128xf32>,
    %c6_i32 = arith.constant 6 : i32
    %c7_i32_70 = arith.constant 7 : i32
    %225 = arith.subi %c7_i32_70, %c6_i32 : i32
    %226 = arith.index_cast %225 : i32 to index
    %c0_71 = arith.constant 0 : index
    %c0_72 = arith.constant 0 : index
    %227 = vector.load %arg11[%226, %c0_71, %c0_72] : memref<8x8x512xf32, #tpu.memory_space<vmem>>, vector<1x8x512xf32>
    %228 = vector.shape_cast %227 : vector<1x8x512xf32> to vector<8x512xf32>
    %cst_73 = arith.constant dense<0.000000e+00> : vector<8x512xf32>
    %229 = tpu.matmul %220, %12, %cst_73 {dimension_numbers = #tpu.dot_dimension_numbers<[1], [0], [0], [1], [0, 0, 1, 1], [], []>} : vector<8x128xf32>, vector<128x512xf32>, vector<8x512xf32> -> vector<8x512xf32>
    %230 = arith.addf %228, %229 : vector<8x512xf32>
    %231 = vector.extract_strided_slice %230 {offsets = [0, 0], sizes = [8, 128], strides = [1, 1]} : vector<8x512xf32> to vector<8x128xf32>
    %232 = arith.negf %231 : vector<8x128xf32>
    %233 = math.exp %232 : vector<8x128xf32>
    %cst_74 = arith.constant 1.000000e+00 : f32
    %234 = vector.broadcast %cst_74 : f32 to vector<8x128xf32>
    %235 = arith.addf %234, %233 : vector<8x128xf32>
    %236 = arith.divf %234, %235 : vector<8x128xf32>
    %237 = vector.extract_strided_slice %230 {offsets = [0, 128], sizes = [8, 128], strides = [1, 1]} : vector<8x512xf32> to vector<8x128xf32>
    %238 = arith.negf %237 : vector<8x128xf32>
    %239 = math.exp %238 : vector<8x128xf32>
    %cst_75 = arith.constant 1.000000e+00 : f32
    %240 = vector.broadcast %cst_75 : f32 to vector<8x128xf32>
    %241 = arith.addf %240, %239 : vector<8x128xf32>
    %242 = arith.divf %240, %241 : vector<8x128xf32>
    %243 = vector.extract_strided_slice %230 {offsets = [0, 256], sizes = [8, 128], strides = [1, 1]} : vector<8x512xf32> to vector<8x128xf32>
    %244 = math.tanh %243 : vector<8x128xf32>
    %245 = vector.extract_strided_slice %230 {offsets = [0, 384], sizes = [8, 128], strides = [1, 1]} : vector<8x512xf32> to vector<8x128xf32>
    %246 = arith.negf %245 : vector<8x128xf32>
    %247 = math.exp %246 : vector<8x128xf32>
    %cst_76 = arith.constant 1.000000e+00 : f32
    %248 = vector.broadcast %cst_76 : f32 to vector<8x128xf32>
    %249 = arith.addf %248, %247 : vector<8x128xf32>
    %250 = arith.divf %248, %249 : vector<8x128xf32>
    %251 = arith.mulf %242, %218 : vector<8x128xf32>
    %252 = arith.mulf %236, %244 : vector<8x128xf32>
    %253 = arith.addf %251, %252 : vector<8x128xf32>
    %254 = math.tanh %253 : vector<8x128xf32>
    %255 = arith.mulf %250, %254 : vector<8x128xf32>
    %256 = arith.index_cast %225 : i32 to index
    %c0_77 = arith.constant 0 : index
    %c0_78 = arith.constant 0 : index
    %257 = vector.load %arg7[%256, %c0_77, %c0_78] : memref<8x8x128xf32, #tpu.memory_space<vmem>>, vector<1x8x128xf32>
    %258 = vector.shape_cast %257 : vector<1x8x128xf32> to vector<8x128xf32>
    %259 = vector.shape_cast %255 : vector<8x128xf32> to vector<1x8x128xf32>
    tpu.vector_store %arg7[%256, %c0_77, %c0_78], %259 {strides = array<i32>} : memref<8x8x128xf32, #tpu.memory_space<vmem>>, vector<1x8x128xf32>,
    %c7_i32_79 = arith.constant 7 : i32
    %c7_i32_80 = arith.constant 7 : i32
    %260 = arith.subi %c7_i32_80, %c7_i32_79 : i32
    %261 = arith.index_cast %260 : i32 to index
    %c0_81 = arith.constant 0 : index
    %c0_82 = arith.constant 0 : index
    %262 = vector.load %arg11[%261, %c0_81, %c0_82] : memref<8x8x512xf32, #tpu.memory_space<vmem>>, vector<1x8x512xf32>
    %263 = vector.shape_cast %262 : vector<1x8x512xf32> to vector<8x512xf32>
    %cst_83 = arith.constant dense<0.000000e+00> : vector<8x512xf32>
    %264 = tpu.matmul %255, %12, %cst_83 {dimension_numbers = #tpu.dot_dimension_numbers<[1], [0], [0], [1], [0, 0, 1, 1], [], []>} : vector<8x128xf32>, vector<128x512xf32>, vector<8x512xf32> -> vector<8x512xf32>
    %265 = arith.addf %263, %264 : vector<8x512xf32>
    %266 = vector.extract_strided_slice %265 {offsets = [0, 0], sizes = [8, 128], strides = [1, 1]} : vector<8x512xf32> to vector<8x128xf32>
    %267 = arith.negf %266 : vector<8x128xf32>
    %268 = math.exp %267 : vector<8x128xf32>
    %cst_84 = arith.constant 1.000000e+00 : f32
    %269 = vector.broadcast %cst_84 : f32 to vector<8x128xf32>
    %270 = arith.addf %269, %268 : vector<8x128xf32>
    %271 = arith.divf %269, %270 : vector<8x128xf32>
    %272 = vector.extract_strided_slice %265 {offsets = [0, 128], sizes = [8, 128], strides = [1, 1]} : vector<8x512xf32> to vector<8x128xf32>
    %273 = arith.negf %272 : vector<8x128xf32>
    %274 = math.exp %273 : vector<8x128xf32>
    %cst_85 = arith.constant 1.000000e+00 : f32
    %275 = vector.broadcast %cst_85 : f32 to vector<8x128xf32>
    %276 = arith.addf %275, %274 : vector<8x128xf32>
    %277 = arith.divf %275, %276 : vector<8x128xf32>
    %278 = vector.extract_strided_slice %265 {offsets = [0, 256], sizes = [8, 128], strides = [1, 1]} : vector<8x512xf32> to vector<8x128xf32>
    %279 = math.tanh %278 : vector<8x128xf32>
    %280 = vector.extract_strided_slice %265 {offsets = [0, 384], sizes = [8, 128], strides = [1, 1]} : vector<8x512xf32> to vector<8x128xf32>
    %281 = arith.negf %280 : vector<8x128xf32>
    %282 = math.exp %281 : vector<8x128xf32>
    %cst_86 = arith.constant 1.000000e+00 : f32
    %283 = vector.broadcast %cst_86 : f32 to vector<8x128xf32>
    %284 = arith.addf %283, %282 : vector<8x128xf32>
    %285 = arith.divf %283, %284 : vector<8x128xf32>
    %286 = arith.mulf %277, %253 : vector<8x128xf32>
    %287 = arith.mulf %271, %279 : vector<8x128xf32>
    %288 = arith.addf %286, %287 : vector<8x128xf32>
    %289 = math.tanh %288 : vector<8x128xf32>
    %290 = arith.mulf %285, %289 : vector<8x128xf32>
    %291 = arith.index_cast %260 : i32 to index
    %c0_87 = arith.constant 0 : index
    %c0_88 = arith.constant 0 : index
    %292 = vector.load %arg7[%291, %c0_87, %c0_88] : memref<8x8x128xf32, #tpu.memory_space<vmem>>, vector<1x8x128xf32>
    %293 = vector.shape_cast %292 : vector<1x8x128xf32> to vector<8x128xf32>
    %294 = vector.shape_cast %290 : vector<8x128xf32> to vector<1x8x128xf32>
    tpu.vector_store %arg7[%291, %c0_87, %c0_88], %294 {strides = array<i32>} : memref<8x8x128xf32, #tpu.memory_space<vmem>>, vector<1x8x128xf32>,
    %c8_i32 = arith.constant 8 : i32
    %c0_89 = arith.constant 0 : index
    %c0_90 = arith.constant 0 : index
    %295 = vector.load %arg9[%c0_89, %c0_90] : memref<8x128xf32, #tpu.memory_space<vmem>>, vector<8x128xf32>
    tpu.vector_store %arg9[%c0_89, %c0_90], %290 {strides = array<i32>} : memref<8x128xf32, #tpu.memory_space<vmem>>, vector<8x128xf32>,
    %c0_91 = arith.constant 0 : index
    %c0_92 = arith.constant 0 : index
    %296 = vector.load %arg10[%c0_91, %c0_92] : memref<8x128xf32, #tpu.memory_space<vmem>>, vector<8x128xf32>
    tpu.vector_store %arg10[%c0_91, %c0_92], %288 {strides = array<i32>} : memref<8x128xf32, #tpu.memory_space<vmem>>, vector<8x128xf32>,
    %c1_i32_93 = arith.constant 1 : i32
    %297 = arith.cmpi eq, %arg0, %c1_i32_93 : i32
    %298 = arith.extui %297 : i1 to i32
    %c0_i32_94 = arith.constant 0 : i32
    %299 = arith.cmpi ne, %298, %c0_i32_94 : i32
    scf.if %299 {
      %c0_95 = arith.constant 0 : index
      %c0_96 = arith.constant 0 : index
      %300 = vector.load %arg8[%c0_95, %c0_96] : memref<8x128xf32, #tpu.memory_space<vmem>>, vector<8x128xf32>
      tpu.vector_store %arg8[%c0_95, %c0_96], %288 {strides = array<i32>} : memref<8x128xf32, #tpu.memory_space<vmem>>, vector<8x128xf32>,
    } else {
    }
    return
  }
  func.func @transform_0(%arg0: i32) -> (i32, i32, i32) {
    %c1_i32 = arith.constant 1 : i32
    %0 = arith.subi %c1_i32, %arg0 : i32
    %c0_i32 = arith.constant 0 : i32
    %c0_i32_0 = arith.constant 0 : i32
    %c0_i32_1 = arith.constant 0 : i32
    return %0, %c0_i32, %c0_i32_0 : i32, i32, i32
  }
  func.func @transform_1(%arg0: i32) -> (i32, i32) {
    %c0_i32 = arith.constant 0 : i32
    %c0_i32_0 = arith.constant 0 : i32
    %c0_i32_1 = arith.constant 0 : i32
    return %c0_i32, %c0_i32_0 : i32, i32
  }
  func.func @transform_2(%arg0: i32) -> (i32, i32) {
    %c0_i32 = arith.constant 0 : i32
    %c0_i32_0 = arith.constant 0 : i32
    %c0_i32_1 = arith.constant 0 : i32
    return %c0_i32, %c0_i32_0 : i32, i32
  }
  func.func @transform_3(%arg0: i32) -> (i32, i32) {
    %c0_i32 = arith.constant 0 : i32
    %c0_i32_0 = arith.constant 0 : i32
    %c0_i32_1 = arith.constant 0 : i32
    return %c0_i32, %c0_i32_0 : i32, i32
  }
  func.func @transform_4(%arg0: i32) -> (i32, i32) {
    %c0_i32 = arith.constant 0 : i32
    %c0_i32_0 = arith.constant 0 : i32
    %c0_i32_1 = arith.constant 0 : i32
    return %c0_i32, %c0_i32_0 : i32, i32
  }
  func.func @transform_5(%arg0: i32) -> (i32, i32) {
    %c0_i32 = arith.constant 0 : i32
    %c0_i32_0 = arith.constant 0 : i32
    %c0_i32_1 = arith.constant 0 : i32
    return %c0_i32, %c0_i32_0 : i32, i32
  }
  func.func @transform_6(%arg0: i32) -> (i32, i32, i32) {
    %c1_i32 = arith.constant 1 : i32
    %0 = arith.subi %c1_i32, %arg0 : i32
    %c0_i32 = arith.constant 0 : i32
    %c0_i32_0 = arith.constant 0 : i32
    %c0_i32_1 = arith.constant 0 : i32
    return %0, %c0_i32, %c0_i32_0 : i32, i32, i32
  }
  func.func @transform_7(%arg0: i32) -> (i32, i32) {
    %c0_i32 = arith.constant 0 : i32
    %c0_i32_0 = arith.constant 0 : i32
    %c0_i32_1 = arith.constant 0 : i32
    return %c0_i32, %c0_i32_0 : i32, i32
  }
}

</mosaic_0001>

<bundles_post_ra>
// kernel: tpu_custom_call.1
= control target key start
LH: loop header
LB: loop body
LE: loop exit
PB: predicated region body
PF: predicated region fallthrough
CT: control target
= control target key end

     0   :  { %13 = vsyncpa [#allocation6], 0  ;;  %s4416_s0 = inlined_call_operand.hbm [shape: f32[16,8,128], index: 0, kind: input, shape index: {}]   ;;  %s4417_s1 = inlined_call_operand.hbm [shape: f32[8,128], index: 1, kind: input, shape index: {}]   ;;  %s4418_s2 = inlined_call_operand.hbm [shape: f32[8,128], index: 2, kind: input, shape index: {}]   ;;  %s4419_s3 = inlined_call_operand.hbm [shape: f32[128,512], index: 3, kind: input, shape index: {}]   ;;  %s4420_s4 = inlined_call_operand.hbm [shape: f32[128,512], index: 4, kind: input, shape index: {}]   ;;  %s4421_s5 = inlined_call_operand.hbm [shape: f32[1,512], index: 5, kind: input, shape index: {}]   ;;  %s4422_s6 = inlined_call_operand.hbm [shape: f32[16,8,128], index: 6, kind: output, shape index: {0}]   ;;  %s4423_s7 = inlined_call_operand.hbm [shape: f32[8,128], index: 7, kind: output, shape index: {1}]  }
   0x1   :  { %15 = vsyncpa [#allocation6 + $0x1], 0 }
   0x2   :  { %16 = vsyncpa [#allocation9], 0 }
   0x3   :  { %17 = vsyncpa [#allocation12], 0 }
   0x4   :  { %18 = vsyncpa [#allocation15], 0 }
   0x5   :  { %19 = vsyncpa [#allocation7], 0 }
   0x6   :  { %21 = vsyncpa [#allocation7 + $0x1], 0 }
   0x7   :  { %22 = vsyncpa [#allocation18], 0  ;;  %s3652_s24 = smov 0   ;;  %s3654_s25 = smov 0  }
   0x8   :  { %s3656_s26 = smov 0   ;;  %s3658_s27 = smov 0  }
   0x9 LB: > { %s3597_s28 = smov [#allocation8]   ;;  %s3673_s30 = sadd.s32 4294967295, %s3595_s27   ;;  %s3595_s27 = sphi %s3658_s27, %s4454_s27   ;;  %s3591_s26 = sphi %s3656_s26, %s4453_s26   ;;  %s3587_s25 = sphi %s3654_s25, %s4452_s25   ;;  %s3583_s24 = sphi %s3652_s24, %s4451_s24  }
   0xa   : > { %s228_s29 = sshll.u32 %s3597_s28, 4  ;;  %p2378_p0 = scmp.ge.s32.totalorder %s3595_s27, 1  ;;  %s229_s29 = int_to_ptr.vmem [resolvable:$true] %s228_s29 }
   0xb   : > { %p4424_p1 = scmp.eq.s32.totalorder %s3673_s30, 0  ;;  %p215_p2 = scmp.lt.s32.totalorder %s3595_s27, 3 }
   0xc   : > { %s3598_s9 = smov [#allocation11]   ;;  %s3599_s12 = smov [#allocation10]  }
   0xd   : > { %p3679_p4 = pnand %p2378_p0, %p215_p2  ;;  %s249_s10 = sshll.u32 %s3598_s9, 4  ;;  %s3686_s10 = int_to_ptr.vmem [resolvable:$true] %s249_s10 }
   0xe   : > { %s239_s13 = sshll.u32 %s3599_s12, 4  ;;  %s3317_s16 = scalar_lea.hbm %s4417_s1, 128  ;;  %s3694_s13 = int_to_ptr.vmem [resolvable:$true] %s239_s13 }
   0xf   : > { %s4428_s8 = scalar_select %p3679_p4, 1, 0 }
  0x10   : > { %p3106_p6 = pneg %p3679_p4  ;;  %p3318_p8 = scmp.ne.s32.totalorder %s4417_s1, %s3317_s16 }
  0x11   : > { %p3324_p12 = scmp.lt.u32.totalorder %s3317_s16, %s4417_s1 }
  0x12   : > { %p3690_p7 = pnand %p3106_p6, %p4424_p1 }
  0x14   : > { %p3704_p9 = pneg %p3690_p7 }
  0x16   : > { %p3320_p10 = pnand %p3704_p9, %p3318_p8 }
  0x18   : > { %p3321_p11 = pneg %p3320_p10 }
  0x1a   : > { %p3326_p13 = pnand %p3324_p12, %p3321_p11 }
  0x1c   : > { %3329 = shalt.err (!%p3326_p13)
}
  0x1d   : > { %s3330_s22 = scalar_lea.vmem %s229_s29, 128  ;;  %p3338_p5 = scmp.lt.s32.totalorder %s229_s29, %s229_s29 }
  0x1e   : > { %p3331_p0 = scmp.ne.s32.totalorder %s229_s29, %s3330_s22  ;;  %p3339_p3 = scmp.lt.s32.totalorder %s3330_s22, %s3330_s22 }
  0x20   : > { %p3333_p2 = pnand %p3331_p0, %p3704_p9  ;;  %p3340_p1 = por %p3339_p3, %p3338_p5 }
  0x22   : > { %p3334_p6 = pneg %p3333_p2 }
  0x24   : > { %p3341_p4 = pnand %p3340_p1, %p3334_p6 }
  0x26   : > { %3344 = shalt.err (!%p3341_p4)
}
  0x27   : > { %3109 = dma.hbm_to_vmem [thread:$0]  (!%p3690_p7), %s4417_s1, 128, %s229_s29, [#allocation9]  }
  0x28   : > { %s3345_s14 = scalar_lea.hbm %s4419_s3, 8192 }
  0x29   : > { %p3346_p8 = scmp.ne.s32.totalorder %s4419_s3, %s3345_s14  ;;  %p3352_p1 = scmp.lt.u32.totalorder %s3345_s14, %s4419_s3 }
  0x2b   : > { %p3348_p10 = pnand %p3346_p8, %p3704_p9 }
  0x2d   : > { %p3349_p3 = pneg %p3348_p10 }
  0x2f   : > { %p3354_p4 = pnand %p3352_p1, %p3349_p3 }
  0x31   : > { %3357 = shalt.err (!%p3354_p4)
}
  0x32   : > { %s3358_s29 = scalar_lea.vmem %s3686_s10, 8192  ;;  %p3366_p13 = scmp.lt.s32.totalorder %s3686_s10, %s3686_s10 }
  0x33   : > { %p3359_p5 = scmp.ne.s32.totalorder %s3686_s10, %s3358_s29  ;;  %p3367_p0 = scmp.lt.s32.totalorder %s3358_s29, %s3358_s29 }
  0x35   : > { %p3361_p11 = pnand %p3359_p5, %p3704_p9  ;;  %p3368_p2 = por %p3367_p0, %p3366_p13 }
  0x37   : > { %p3362_p12 = pneg %p3361_p11 }
  0x39   : > { %p3369_p6 = pnand %p3368_p2, %p3362_p12 }
  0x3b   : > { %3372 = shalt.err (!%p3369_p6)
}
  0x3c   : > { %s3600_s20 = smov 512   ;;  %s3601_s21 = smov 32  }
  0x3d   : > { %3115 = dma.hbm_to_vmem [thread:$0]  (!%p3690_p7), %s4419_s3, 8192, %s3686_s10, [#allocation12], %s3600_s20, %s3600_s20, %s3601_s21  }
  0x3e   : > { %s3373_s12 = scalar_lea.hbm %s4418_s2, 128 }
  0x3f   : > { %p3374_p8 = scmp.ne.s32.totalorder %s4418_s2, %s3373_s12  ;;  %p3380_p1 = scmp.lt.u32.totalorder %s3373_s12, %s4418_s2 }
  0x41   : > { %p3376_p10 = pnand %p3374_p8, %p3704_p9 }
  0x43   : > { %p3377_p3 = pneg %p3376_p10 }
  0x45   : > { %p3382_p4 = pnand %p3380_p1, %p3377_p3 }
  0x47   : > { %3385 = shalt.err (!%p3382_p4)
}
  0x48   : > { %s3386_s10 = scalar_lea.vmem %s3694_s13, 128  ;;  %p3394_p13 = scmp.lt.s32.totalorder %s3694_s13, %s3694_s13 }
  0x49   : > { %p3387_p5 = scmp.ne.s32.totalorder %s3694_s13, %s3386_s10  ;;  %p3395_p0 = scmp.lt.s32.totalorder %s3386_s10, %s3386_s10 }
  0x4b   : > { %p3389_p11 = pnand %p3387_p5, %p3704_p9  ;;  %p3396_p2 = por %p3395_p0, %p3394_p13 }
  0x4d   : > { %p3390_p12 = pneg %p3389_p11 }
  0x4f   : > { %p3397_p6 = pnand %p3396_p2, %p3390_p12 }
  0x51   : > { %3400 = shalt.err (!%p3397_p6)
}
  0x52   : > { %3112 = dma.hbm_to_vmem [thread:$0]  (!%p3690_p7), %s4418_s2, 128, %s3694_s13, [#allocation9]  }
  0x53   : > { %s3602_s22 = smov [#allocation13]   ;;  %s3603_s28 = smov [#allocation14]  }
  0x54   : > { %s262_s23 = sshll.u32 %s3602_s22, 4  ;;  %s276_s9 = sshll.u32 %s3603_s28, 4  ;;  %s263_s23 = int_to_ptr.vmem [resolvable:$true] %s262_s23  ;;  %s277_s9 = int_to_ptr.vmem [resolvable:$true] %s276_s9 }
  0x55   : > { %s3401_s15 = scalar_lea.hbm %s4420_s4, 8192 }
  0x56   : > { %p3402_p8 = scmp.ne.s32.totalorder %s4420_s4, %s3401_s15  ;;  %p3408_p1 = scmp.lt.u32.totalorder %s3401_s15, %s4420_s4 }
  0x58   : > { %p3404_p10 = pnand %p3402_p8, %p3704_p9 }
  0x5a   : > { %p3405_p3 = pneg %p3404_p10 }
  0x5c   : > { %p3410_p4 = pnand %p3408_p1, %p3405_p3 }
  0x5e   : > { %3413 = shalt.err (!%p3410_p4)
}
  0x5f   : > { %s3414_s13 = scalar_lea.vmem %s263_s23, 8192  ;;  %p3422_p13 = scmp.lt.s32.totalorder %s263_s23, %s263_s23 }
  0x60   : > { %p3415_p5 = scmp.ne.s32.totalorder %s263_s23, %s3414_s13  ;;  %p3423_p0 = scmp.lt.s32.totalorder %s3414_s13, %s3414_s13 }
  0x62   : > { %p3417_p11 = pnand %p3415_p5, %p3704_p9  ;;  %p3424_p2 = por %p3423_p0, %p3422_p13 }
  0x64   : > { %p3418_p12 = pneg %p3417_p11 }
  0x66   : > { %p3425_p6 = pnand %p3424_p2, %p3418_p12 }
  0x68   : > { %3428 = shalt.err (!%p3425_p6)
}
  0x69   : > { %3118 = dma.hbm_to_vmem [thread:$0]  (!%p3690_p7), %s4420_s4, 8192, %s263_s23, [#allocation12], %s3600_s20, %s3600_s20, %s3601_s21  }
  0x6a   : > { %s3429_s14 = scalar_lea.hbm %s4421_s5, 64 }
  0x6b   : > { %p3430_p8 = scmp.ne.s32.totalorder %s4421_s5, %s3429_s14  ;;  %p3436_p1 = scmp.lt.u32.totalorder %s3429_s14, %s4421_s5 }
  0x6d   : > { %p3432_p10 = pnand %p3430_p8, %p3704_p9 }
  0x6f   : > { %p3433_p3 = pneg %p3432_p10 }
  0x71   : > { %p3438_p4 = pnand %p3436_p1, %p3433_p3 }
  0x73   : > { %3441 = shalt.err (!%p3438_p4)
}
  0x74   : > { %s3442_s18 = scalar_lea.vmem %s277_s9, 64  ;;  %p3450_p13 = scmp.lt.s32.totalorder %s277_s9, %s277_s9 }
  0x75   : > { %p3443_p5 = scmp.ne.s32.totalorder %s277_s9, %s3442_s18  ;;  %p3451_p0 = scmp.lt.s32.totalorder %s3442_s18, %s3442_s18 }
  0x77   : > { %p3445_p11 = pnand %p3443_p5, %p3704_p9  ;;  %p3452_p2 = por %p3451_p0, %p3450_p13 }
  0x79   : > { %p3446_p12 = pneg %p3445_p11 }
  0x7b   : > { %p3453_p6 = pnand %p3452_p2, %p3446_p12 }
  0x7d   : > { %3456 = shalt.err (!%p3453_p6)
}
  0x7e   : > { %3121 = dma.hbm_to_vmem [thread:$0]  (!%p3690_p7), %s4421_s5, 64, %s277_s9, [#allocation15]  }
  0x7f   : > { %s2377_s19 = sadd.s32 4294967294, %s3595_s27   ;;  %s3810_s11 = sadd.s32 1, %s3595_s27  }
  0x80   : > { %s32_s23 = ssub.s32 1, %s3595_s27  ;;  %s33_s13 = ssub.s32 1, %s3810_s11 }
  0x81   : > { %s37_s29 = sadd.s32 1, %s3591_s26  ;;  %s34_s22 = ssub.s32 %s32_s23, %s33_s13 }
  0x82   : > { %p44_p9 = scmp.ne.s32.totalorder %s3591_s26, %s3587_s25  ;;  %p35_p8 = scmp.eq.s32.totalorder %s34_s22, 0 }
  0x83   : > { %p45_p10 = scmp.eq.s32.totalorder %s3595_s27, 0  ;;  %p50_p3 = scmp.ne.s32.totalorder %s3587_s25, %s3583_s24 }
  0x84   : > { %p4426_p1 = scmp.eq.s32.totalorder %s3673_s30, 1  ;;  %p4431_p5 = scmp.eq.s32.totalorder %s3673_s30, 0 }
  0x85   : > { %s3822_s28 = scalar_select %p35_p8, %s3591_s26, %s37_s29  }
  0x86   : > { %p46_p4 = por %p45_p10, %p44_p9  ;;  %p3826_p7 = por %p4431_p5, %p50_p3 }
  0x87   : > { %p3832_p11 = por %p4426_p1, %p44_p9  ;;  %p187_p12 = scmp.eq.s32.totalorder %s2377_s19, 1 }
  0x88   : > { %p3135_p13 = scmp.lt.s32.totalorder %s3595_s27, 2  ;;  %s287_s14 = sand.u32 1, %s3591_s26  }
  0x89   : > { %s4433_s12 = scalar_select %p3832_p11, 1, 0 }
  0x8a   : > { %p3838_p0 = por %p187_p12, %p50_p3  ;;  %s2385_s16 = sshll.u32 %s287_s14, 6 }
  0x8b   : > { %s2436_s17 = sshll.u32 %s32_s23, 10  ;;  %s291_s21 = scalar_lea.vmem [#allocation5], %s2385_s16 }
  0x8c   : > { %s4434_s15 = scalar_select %p3838_p0, 1, 0 }
  0x8d   : > { %s3845_s20 = scalar_lea.hbm %s4416_s0, %s2436_s17  ;;  %s299_s13 = sshll.u32 %s291_s21, 4  ;;  %s3851_s13 = int_to_ptr.vmem [resolvable:$true] %s299_s13 }
  0x8e   : > { %p3847_p2 = pnand %p3135_p13, %p46_p4  ;;  %s3853_s23 = scalar_lea.sflag [#allocation6], %s287_s14 }
  0x8f   : > { %s3457_s29 = scalar_lea.hbm %s3845_s20, 1024  ;;  %s3462_s17 = scalar_lea.hbm %s4416_s0, 2048 }
  0x90   : > { %p3458_p6 = scmp.ne.s32.totalorder %s3845_s20, %s3457_s29  ;;  %p3459_p9 = pneg %p3847_p2 }
  0x91   : > { %p3463_p3 = scmp.lt.u32.totalorder %s3845_s20, %s4416_s0  ;;  %p3464_p4 = scmp.lt.u32.totalorder %s3462_s17, %s3457_s29 }
  0x92   : > { %p3460_p8 = pnand %p3459_p9, %p3458_p6  ;;  %p3466_p12 = scmp.lt.u32.totalorder %s3457_s29, %s3845_s20 }
  0x93   : > { %p3465_p5 = por %p3464_p4, %p3463_p3 }
  0x94   : > { %p3461_p10 = pneg %p3460_p8 }
  0x95   : > { %p3467_p13 = por %p3466_p12, %p3465_p5 }
  0x97   : > { %p3468_p1 = pnand %p3467_p13, %p3461_p10 }
  0x99   : > { %3471 = shalt.err (!%p3468_p1)
}
  0x9a   : > { %s3472_s14 = scalar_lea.vmem %s3851_s13, 1024  ;;  %s3604_s21 = smov [#allocation5]  }
  0x9b   : > { %p3473_p6 = scmp.ne.s32.totalorder %s3851_s13, %s3472_s14  ;;  %s3477_s22 = sshll.u32 %s3604_s21, 4  ;;  %s3478_s22 = int_to_ptr.vmem [resolvable:$false] %s3477_s22 }
  0x9c   : > { %s3479_s16 = scalar_lea.vmem %s3478_s22, 2048  ;;  %p3480_p11 = scmp.lt.s32.totalorder %s3851_s13, %s3478_s22 }
  0x9d   : > { %p3475_p8 = pnand %p3473_p6, %p3459_p9  ;;  %p3481_p3 = scmp.lt.s32.totalorder %s3479_s16, %s3472_s14 }
  0x9f   : > { %p3476_p0 = pneg %p3475_p8  ;;  %p3482_p4 = por %p3481_p3, %p3480_p11 }
  0xa1   : > { %p3483_p5 = pnand %p3482_p4, %p3476_p0 }
  0xa3   : > { %3486 = shalt.err (!%p3483_p5)
}
  0xa4   : > { %s3605_s29 = smov 128   ;;  %s3606_s17 = smov 8  }
  0xa5   : > { %3125 = dma.hbm_to_vmem [thread:$0]  (!%p3847_p2), %s3845_s20, 1024, %s3851_s13, %s3853_s23, %s3605_s29, %s3605_s29, %s3606_s17  }
  0xa6   : > { %p4436_p1 = scmp.ne.s32.totalorder %s4428_s8, 0 }
  0xa7   : > { %s3884_s10 = sand.u32 (!%p4436_p1), 1, %s3587_s25  }
  0xa8   : > { %311 = sbr.rel (%p4436_p1) target bundleno = 2387 (0x953), region = 44  ;;  %s2389_s18 = sshll.u32 (!%p4436_p1), %s3884_s10, 6 }
  0xa9   : > { %s314_s14 = scalar_lea.sflag (!%p4436_p1), [#allocation6], %s3884_s10  ;;  %s3888_s21 = scalar_lea.vmem (!%p4436_p1), [#allocation5], %s2389_s18 }
  0xaf   : > { %3558 = dma.done.wait (%p3826_p7), %s314_s14, 1024  }
  0xb0   : > { %3560 = vsyncadd (%p3826_p7), %s314_s14, 4294966272  ;;  %p4437_p11 = scmp.eq.s32.totalorder %s3673_s30, 0 }
  0xb2   : > { %3562 = dma.done.wait (%p4437_p11), [#allocation9], 256   ;;  %p4438_p0 = pmov %p4437_p11 }
  0xb4   : > { %3564 = vsyncadd (%p4438_p0), [#allocation9], 4294967040  ;;  %p4439_p2 = pmov %p4438_p0 }
  0xb5   : > { %p4440_p9 = pmov %p4438_p0 }
  0xb6   : > { %3566 = dma.done.wait (%p4439_p2), [#allocation12], 16384  }
  0xb7   : > { %3568 = vsyncadd (%p4440_p9), [#allocation12], 4294950912  ;;  %p4441_p10 = pmov %p4438_p0 }
  0xb8   : > { %p4442_p12 = pmov %p4438_p0 }
  0xb9   : > { %3570 = dma.done.wait (%p4441_p10), [#allocation15], 64  }
  0xba   : > { %3572 = vsyncadd (%p4442_p12), [#allocation15], 4294967232  ;;  %s3906_s8 = scalar_lea.vmem [#allocation16], %s2389_s18  ;;  %p4443_p7 = scmp.ne.s32.totalorder %s3673_s30, 0 }
  0xbb   : > { %v376_v0 = vld [vmem:[#allocation8] sm:$0xff] (!%p4443_p7)  ;;  %v378_v1 = vld [vmem:[#allocation10] sm:$0xff] (!%p4443_p7) }
  0xbc   : > { %375 = sbr.rel (%p4443_p7) target bundleno = 195 (0xc3), region = 72  ;;  %377 = vst [vmem:[#allocation2] sm:$0xff] (!%p4443_p7), %v376_v0  ;;  %379 = vst [vmem:[#allocation3] sm:$0xff] (!%p4443_p7), %v378_v1 }
  0xc3 PF: > { %v389_v2 = vld [vmem:[#allocation11 + $0x8] sm:$0xff]  ;;  %v388_v4 = vld [vmem:[#allocation11] sm:$0xff]  ;;  %v3607_v9 = vmov 0.0   ;;  %v391_v14 = vld [vmem:[#allocation11 + $0x18] sm:$0xff]  ;;  %p2428_p13 = scmp.ne.s32.totalorder %s3673_s30, 1 }
  0xc4   : > { %v393_v3 = vld [vmem:[#allocation11 + $0x28] sm:$0xff]  ;;  %v392_v6 = vld [vmem:[#allocation11 + $0x20] sm:$0xff]  ;;  %538 = vmatprep.mubr.f32.mxu0 %v3607_v9  ;;  %651 = vmatprep.mubr.f32.mxu1 %v3607_v9  ;;  %v395_v15 = vld [vmem:[#allocation11 + $0x38] sm:$0xff] }
  0xc5   : > { %v2438_v5 = vpack.c.bf16 %v393_v3, %v389_v2  ;;  %v397_v7 = vld [vmem:[#allocation11 + $0x48] sm:$0xff]  ;;  %v2440_v10 = vpack.c.bf16 %v392_v6, %v388_v4  ;;  %v396_v12 = vld [vmem:[#allocation11 + $0x40] sm:$0xff]  ;;  %v2470_v19 = vpack.c.bf16 %v395_v15, %v391_v14  ;;  %v390_v20 = vld [vmem:[#allocation11 + $0x10] sm:$0xff] }
  0xc6   : > { %v401_v8 = vld [vmem:[#allocation11 + $0x68] sm:$0xff]  ;;  %v400_v13 = vld [vmem:[#allocation11 + $0x60] sm:$0xff]  ;;  %v394_v21 = vld [vmem:[#allocation11 + $0x30] sm:$0xff] }
  0xc7   : > { %v2442_v11 = vpack.c.bf16 %v401_v8, %v397_v7  ;;  %2439 = vmatprep.subr.bf16.mxu0 %v2438_v5  ;;  %v405_v16 = vld [vmem:[#allocation11 + $0x88] sm:$0xff]  ;;  %v2444_v18 = vpack.c.bf16 %v400_v13, %v396_v12  ;;  %v404_v22 = vld [vmem:[#allocation11 + $0x80] sm:$0xff]  ;;  %v2472_v24 = vpack.c.bf16 %v394_v21, %v390_v20  ;;  %v399_v26 = vld [vmem:[#allocation11 + $0x58] sm:$0xff]  ;;  %2471 = vmatprep.subr.bf16.mxu1 %v2470_v19 }
  0xc8   : > { %v409_v17 = vld [vmem:[#allocation11 + $0xa8] sm:$0xff]  ;;  %2441 = vmatpush1.bf16.msra.mxu0 %v2440_v10  ;;  %v408_v25 = vld [vmem:[#allocation11 + $0xa0] sm:$0xff]  ;;  %v403_v27 = vld [vmem:[#allocation11 + $0x78] sm:$0xff] }
  0xc9   : > { %2443 = vmatprep.subr.bf16.mxu0 %v2442_v11  ;;  %v2446_v23 = vpack.c.bf16 %v409_v17, %v405_v16  ;;  %v2474_v28 = vpack.c.bf16 %v403_v27, %v399_v26  ;;  %v413_v29 = vld [vmem:[#allocation11 + $0xc8] sm:$0xff]  ;;  %v398_v31 = vld [vmem:[#allocation11 + $0x50] sm:$0xff]  ;;  %2473 = vmatpush1.bf16.msra.mxu1 %v2472_v24  ;;  %v2448_v33 = vpack.c.bf16 %v408_v25, %v404_v22  ;;  %v412_v35 = vld [vmem:[#allocation11 + $0xc0] sm:$0xff] }
  0xca   : > { %v417_v30 = vld [vmem:[#allocation11 + $0xe8] sm:$0xff]  ;;  %v402_v32 = vld [vmem:[#allocation11 + $0x70] sm:$0xff]  ;;  %v407_v36 = vld [vmem:[#allocation11 + $0x98] sm:$0xff] }
  0xcb   : > { %2475 = vmatprep.subr.bf16.mxu1 %v2474_v28  ;;  %v2476_v34 = vpack.c.bf16 %v402_v32, %v398_v31  ;;  %v411_v37 = vld [vmem:[#allocation11 + $0xb8] sm:$0xff]  ;;  %v2450_v38 = vpack.c.bf16 %v417_v30, %v413_v29  ;;  %v416_v39 = vld [vmem:[#allocation11 + $0xe0] sm:$0xff]  ;;  %v406_v41 = vld [vmem:[#allocation11 + $0x90] sm:$0xff] }
  0xcc   : > { %2445 = vmatpush1.bf16.msra.mxu0 %v2444_v18  ;;  %v2478_v40 = vpack.c.bf16 %v411_v37, %v407_v36  ;;  %v410_v42 = vld [vmem:[#allocation11 + $0xb0] sm:$0xff]  ;;  %v421_v43 = vld [vmem:[#allocation11 + $0x108] sm:$0xff]  ;;  %v415_v45 = vld [vmem:[#allocation11 + $0xd8] sm:$0xff]  ;;  %v2452_v48 = vpack.c.bf16 %v416_v39, %v412_v35 }
  0xcd   : > { %2447 = vmatprep.subr.bf16.mxu0 %v2446_v23  ;;  %v425_v44 = vld [vmem:[#allocation11 + $0x128] sm:$0xff]  ;;  %2477 = vmatpush1.bf16.msra.mxu1 %v2476_v34  ;;  %v2480_v46 = vpack.c.bf16 %v410_v42, %v406_v41  ;;  %v419_v47 = vld [vmem:[#allocation11 + $0xf8] sm:$0xff]  ;;  %v420_v49 = vld [vmem:[#allocation11 + $0x100] sm:$0xff] }
  0xce   : > { %2479 = vmatprep.subr.bf16.mxu1 %v2478_v40  ;;  %v2482_v50 = vpack.c.bf16 %v419_v47, %v415_v45  ;;  %v414_v51 = vld [vmem:[#allocation11 + $0xd0] sm:$0xff]  ;;  %v2454_v53 = vpack.c.bf16 %v425_v44, %v421_v43  ;;  %v424_v54 = vld [vmem:[#allocation11 + $0x120] sm:$0xff]  ;;  %v423_v55 = vld [vmem:[#allocation11 + $0x118] sm:$0xff] }
  0xcf   : > { %v418_v52 = vld [vmem:[#allocation11 + $0xf0] sm:$0xff]  ;;  %v427_v56 = vld [vmem:[#allocation11 + $0x138] sm:$0xff]  ;;  %v429_v57 = vld [vmem:[#allocation11 + $0x148] sm:$0xff]  ;;  %v2456_v60 = vpack.c.bf16 %v424_v54, %v420_v49 }
  0xd0   : > { %2449 = vmatpush1.bf16.msra.mxu0 %v2448_v33  ;;  %v433_v58 = vld [vmem:[#allocation11 + $0x168] sm:$0xff]  ;;  %v2484_v59 = vpack.c.bf16 %v418_v52, %v414_v51  ;;  %v428_v61 = vld [vmem:[#allocation11 + $0x140] sm:$0xff]  ;;  %v2486_v62 = vpack.c.bf16 %v427_v56, %v423_v55  ;;  %v422_v63 = vld [vmem:[#allocation11 + $0x110] sm:$0xff] }
  0xd1   : > { %2451 = vmatprep.subr.bf16.mxu0 %v2450_v38  ;;  %2481 = vmatpush1.bf16.msra.mxu1 %v2480_v46  ;;  %v426_v0 = vld [vmem:[#allocation11 + $0x130] sm:$0xff]  ;;  %v2458_v1 = vpack.c.bf16 %v433_v58, %v429_v57  ;;  %v432_v2 = vld [vmem:[#allocation11 + $0x160] sm:$0xff]  ;;  %v431_v3 = vld [vmem:[#allocation11 + $0x158] sm:$0xff] }
  0xd2   : > { %2483 = vmatprep.subr.bf16.mxu1 %v2482_v50  ;;  %v435_v4 = vld [vmem:[#allocation11 + $0x178] sm:$0xff]  ;;  %v437_v5 = vld [vmem:[#allocation11 + $0x188] sm:$0xff]  ;;  %v2488_v7 = vpack.c.bf16 %v426_v0, %v422_v63  ;;  %v2460_v8 = vpack.c.bf16 %v432_v2, %v428_v61  ;;  %v436_v10 = vld [vmem:[#allocation11 + $0x180] sm:$0xff] }
  0xd3   : > { %v441_v6 = vld [vmem:[#allocation11 + $0x1a8] sm:$0xff]  ;;  %v2490_v11 = vpack.c.bf16 %v435_v4, %v431_v3  ;;  %v430_v12 = vld [vmem:[#allocation11 + $0x150] sm:$0xff]  ;;  %v440_v15 = vld [vmem:[#allocation11 + $0x1a0] sm:$0xff] }
  0xd4   : > { %2453 = vmatpush1.bf16.msra.mxu0 %v2452_v48  ;;  %v434_v13 = vld [vmem:[#allocation11 + $0x170] sm:$0xff]  ;;  %v2462_v14 = vpack.c.bf16 %v441_v6, %v437_v5  ;;  %v439_v16 = vld [vmem:[#allocation11 + $0x198] sm:$0xff]  ;;  %v445_v18 = vld [vmem:[#allocation11 + $0x1c8] sm:$0xff]  ;;  %v2464_v21 = vpack.c.bf16 %v440_v15, %v436_v10 }
  0xd5   : > { %2455 = vmatprep.subr.bf16.mxu0 %v2454_v53  ;;  %2485 = vmatpush1.bf16.msra.mxu1 %v2484_v59  ;;  %v443_v17 = vld [vmem:[#allocation11 + $0x1b8] sm:$0xff]  ;;  %v449_v19 = vld [vmem:[#allocation11 + $0x1e8] sm:$0xff]  ;;  %v2492_v20 = vpack.c.bf16 %v434_v13, %v430_v12  ;;  %v444_v22 = vld [vmem:[#allocation11 + $0x1c0] sm:$0xff] }
  0xd6   : > { %2487 = vmatprep.subr.bf16.mxu1 %v2486_v62  ;;  %v2494_v23 = vpack.c.bf16 %v443_v17, %v439_v16  ;;  %v438_v24 = vld [vmem:[#allocation11 + $0x190] sm:$0xff]  ;;  %v2466_v26 = vpack.c.bf16 %v449_v19, %v445_v18  ;;  %v448_v27 = vld [vmem:[#allocation11 + $0x1e0] sm:$0xff]  ;;  %v447_v28 = vld [vmem:[#allocation11 + $0x1d8] sm:$0xff] }
  0xd7   : > { %v442_v25 = vld [vmem:[#allocation11 + $0x1b0] sm:$0xff]  ;;  %v451_v29 = vld [vmem:[#allocation11 + $0x1f8] sm:$0xff]  ;;  %v733_v30 = vld [vmem:[#allocation13 + $0x8] sm:$0xff]  ;;  %v2468_v33 = vpack.c.bf16 %v448_v27, %v444_v22 }
  0xd8   : > { %2457 = vmatpush1.bf16.msra.mxu0 %v2456_v60  ;;  %v737_v31 = vld [vmem:[#allocation13 + $0x28] sm:$0xff]  ;;  %v2496_v32 = vpack.c.bf16 %v442_v25, %v438_v24  ;;  %v2498_v34 = vpack.c.bf16 %v451_v29, %v447_v28  ;;  %v446_v35 = vld [vmem:[#allocation11 + $0x1d0] sm:$0xff]  ;;  %v732_v38 = vld [vmem:[#allocation13] sm:$0xff] }
  0xd9   : > { %2459 = vmatprep.subr.bf16.mxu0 %v2458_v1  ;;  %2489 = vmatpush1.bf16.msra.mxu1 %v2488_v7  ;;  %v450_v36 = vld [vmem:[#allocation11 + $0x1f0] sm:$0xff]  ;;  %v3912_v37 = vpack.c.bf16 %v737_v31, %v733_v30  ;;  %v736_v39 = vld [vmem:[#allocation13 + $0x20] sm:$0xff]  ;;  %v741_v40 = vld [vmem:[#allocation13 + $0x48] sm:$0xff] }
  0xda   : > { %2491 = vmatprep.subr.bf16.mxu1 %v2490_v11  ;;  %v745_v41 = vld [vmem:[#allocation13 + $0x68] sm:$0xff]  ;;  %v735_v42 = vld [vmem:[#allocation13 + $0x18] sm:$0xff]  ;;  %v2500_v44 = vpack.c.bf16 %v450_v36, %v446_v35  ;;  %v380_v45 = vld [vmem:[%s3888_s21] sm:$0xff]  ;;  %v3915_v46 = vpack.c.bf16 %v736_v39, %v732_v38 }
  0xdb   : > { %v739_v43 = vld [vmem:[#allocation13 + $0x38] sm:$0xff]  ;;  %v3918_v47 = vpack.c.bf16 %v745_v41, %v741_v40  ;;  %v740_v48 = vld [vmem:[#allocation13 + $0x40] sm:$0xff]  ;;  %v749_v50 = vld [vmem:[#allocation13 + $0x88] sm:$0xff] }
  0xdc   : > { %2461 = vmatpush1.bf16.msra.mxu0 %v2460_v8  ;;  %v744_v49 = vld [vmem:[#allocation13 + $0x60] sm:$0xff]  ;;  %v3920_v51 = vpack.c.bf16 %v739_v43, %v735_v42  ;;  %v753_v52 = vld [vmem:[#allocation13 + $0xa8] sm:$0xff]  ;;  %v734_v53 = vld [vmem:[#allocation13 + $0x10] sm:$0xff] }
  0xdd   : > { %2463 = vmatprep.subr.bf16.mxu0 %v2462_v14  ;;  %2493 = vmatpush1.bf16.msra.mxu1 %v2492_v20  ;;  %v738_v54 = vld [vmem:[#allocation13 + $0x30] sm:$0xff]  ;;  %v743_v55 = vld [vmem:[#allocation13 + $0x58] sm:$0xff]  ;;  %v3925_v58 = vpack.c.bf16 %v744_v49, %v740_v48  ;;  %v3928_v59 = vpack.c.bf16 %v753_v52, %v749_v50  ;;  %v748_v60 = vld [vmem:[#allocation13 + $0x80] sm:$0xff] }
  0xde   : > { %2495 = vmatprep.subr.bf16.mxu1 %v2494_v23  ;;  %v747_v56 = vld [vmem:[#allocation13 + $0x78] sm:$0xff]  ;;  %v752_v61 = vld [vmem:[#allocation13 + $0xa0] sm:$0xff]  ;;  %v3931_v62 = vpack.c.bf16 %v738_v54, %v734_v53  ;;  %v757_v63 = vld [vmem:[#allocation13 + $0xc8] sm:$0xff] }
  0xdf   : > { %v381_v57 = vld [vmem:[%s3888_s21 + $0x8] sm:$0xff]  ;;  %v761_v0 = vld [vmem:[#allocation13 + $0xe8] sm:$0xff]  ;;  %v3933_v1 = vpack.c.bf16 %v747_v56, %v743_v55  ;;  %v742_v2 = vld [vmem:[#allocation13 + $0x50] sm:$0xff]  ;;  %v3939_v7 = vpack.c.bf16 %v752_v61, %v748_v60 }
  0xe0   : > { %2465 = vmatpush1.bf16.msra.mxu0 %v2464_v21  ;;  %v746_v3 = vld [vmem:[#allocation13 + $0x70] sm:$0xff]  ;;  %v751_v4 = vld [vmem:[#allocation13 + $0x98] sm:$0xff]  ;;  %v382_v6 = vld [vmem:[%s3888_s21 + $0x10] sm:$0xff]  ;;  %v3943_v8 = vpack.c.bf16 %v761_v0, %v757_v63 }
  0xe1   : > { %2467 = vmatprep.subr.bf16.mxu0 %v2466_v26  ;;  %2497 = vmatpush1.bf16.msra.mxu1 %v2496_v32  ;;  %v755_v5 = vld [vmem:[#allocation13 + $0xb8] sm:$0xff]  ;;  %v756_v10 = vld [vmem:[#allocation13 + $0xc0] sm:$0xff]  ;;  %v3945_v12 = vpack.c.bf16 %v746_v3, %v742_v2  ;;  %v765_v13 = vld [vmem:[#allocation13 + $0x108] sm:$0xff] }
  0xe2   : > { %2499 = vmatprep.subr.bf16.mxu1 %v2498_v34  ;;  %v760_v11 = vld [vmem:[#allocation13 + $0xe0] sm:$0xff]  ;;  %v769_v14 = vld [vmem:[#allocation13 + $0x128] sm:$0xff]  ;;  %v3948_v15 = vpack.c.bf16 %v755_v5, %v751_v4  ;;  %v750_v16 = vld [vmem:[#allocation13 + $0x90] sm:$0xff] }
  0xe3   : > { %v754_v17 = vld [vmem:[#allocation13 + $0xb0] sm:$0xff]  ;;  %v759_v18 = vld [vmem:[#allocation13 + $0xd8] sm:$0xff]  ;;  %v383_v20 = vld [vmem:[%s3888_s21 + $0x18] sm:$0xff]  ;;  %v3954_v21 = vpack.c.bf16 %v760_v11, %v756_v10  ;;  %v3958_v22 = vpack.c.bf16 %v769_v14, %v765_v13 }
  0xe4   : > { %2469 = vmatpush1.bf16.msra.mxu0 %v2468_v33  ;;  %v763_v19 = vld [vmem:[#allocation13 + $0xf8] sm:$0xff]  ;;  %v764_v23 = vld [vmem:[#allocation13 + $0x100] sm:$0xff]  ;;  %v3960_v25 = vpack.c.bf16 %v754_v17, %v750_v16  ;;  %v773_v26 = vld [vmem:[#allocation13 + $0x148] sm:$0xff] }
  0xe5   : > { %2503 = vmatprep.subr.bf16.mxu0 %v3912_v37  ;;  %2501 = vmatpush1.bf16.msra.mxu1 %v2500_v44  ;;  %v768_v24 = vld [vmem:[#allocation13 + $0x120] sm:$0xff]  ;;  %v777_v27 = vld [vmem:[#allocation13 + $0x168] sm:$0xff]  ;;  %v3963_v28 = vpack.c.bf16 %v763_v19, %v759_v18  ;;  %v758_v29 = vld [vmem:[#allocation13 + $0xd0] sm:$0xff] }
  0xe6   : > { %2535 = vmatprep.subr.bf16.mxu1 %v3920_v51  ;;  %v762_v30 = vld [vmem:[#allocation13 + $0xf0] sm:$0xff]  ;;  %v767_v31 = vld [vmem:[#allocation13 + $0x118] sm:$0xff]  ;;  %v3969_v34 = vpack.c.bf16 %v768_v24, %v764_v23  ;;  %v3973_v35 = vpack.c.bf16 %v777_v27, %v773_v26  ;;  %v772_v36 = vld [vmem:[#allocation13 + $0x140] sm:$0xff] }
  0xe7   : > { %539 = vmatmul.mubr.f32.vlgmr.msra.gmra.mrb[0].mxu0 %v380_v45  ;;  %v771_v32 = vld [vmem:[#allocation13 + $0x138] sm:$0xff]  ;;  %v384_v33 = vld [vmem:[%s3888_s21 + $0x20] sm:$0xff]  ;;  %v776_v38 = vld [vmem:[#allocation13 + $0x160] sm:$0xff]  ;;  %v3975_v39 = vpack.c.bf16 %v762_v30, %v758_v29 }
  0xe8   : > { %2505 = vmatpush1.bf16.msra.mxu0 %v3915_v46  ;;  %544 = vmatprep.mubr.f32.mxu0 %v3607_v9  ;;  %v781_v40 = vld [vmem:[#allocation13 + $0x188] sm:$0xff]  ;;  %v3978_v42 = vpack.c.bf16 %v771_v32, %v767_v31  ;;  %v766_v43 = vld [vmem:[#allocation13 + $0x110] sm:$0xff]  ;;  %v779_v48 = vld [vmem:[#allocation13 + $0x178] sm:$0xff]  ;;  %v3984_v50 = vpack.c.bf16 %v776_v38, %v772_v36  ;;  %v454_v31 = vlaneseq }
  0xe9   : > { %2507 = vmatprep.subr.bf16.mxu0 %v3918_v47  ;;  %652 = vmatmul.mubr.f32.vlgmr.msra.gmra.mrb[0].mxu1 %v380_v45  ;;  %v785_v41 = vld [vmem:[#allocation13 + $0x1a8] sm:$0xff]  ;;  %v770_v44 = vld [vmem:[#allocation13 + $0x130] sm:$0xff]  ;;  %v775_v45 = vld [vmem:[#allocation13 + $0x158] sm:$0xff] }
  0xea   : > { %657 = vmatprep.mubr.f32.mxu1 %v3607_v9  ;;  %2537 = vmatpush1.bf16.msra.mxu1 %v3931_v62  ;;  %v385_v49 = vld [vmem:[%s3888_s21 + $0x28] sm:$0xff]  ;;  %v3988_v52 = vpack.c.bf16 %v785_v41, %v781_v40  ;;  %v780_v53 = vld [vmem:[#allocation13 + $0x180] sm:$0xff]  ;;  %v3990_v55 = vpack.c.bf16 %v770_v44, %v766_v43  ;;  %v789_v56 = vld [vmem:[#allocation13 + $0x1c8] sm:$0xff]  ;;  %v455_v32 = vshrl.u32 %v454_v31, 7 }
  0xeb   : > { %545 = vmatmul.mubr.f32.gmra.mrb[2].mxu0 %v381_v57  ;;  %2539 = vmatprep.subr.bf16.mxu1 %v3933_v1  ;;  %v784_v54 = vld [vmem:[#allocation13 + $0x1a0] sm:$0xff]  ;;  %v793_v60 = vld [vmem:[#allocation13 + $0x1e8] sm:$0xff]  ;;  %v774_v61 = vld [vmem:[#allocation13 + $0x150] sm:$0xff] }
  0xec   : > { %2509 = vmatpush1.bf16.msra.mxu0 %v3925_v58  ;;  %550 = vmatprep.mubr.f32.mxu0 %v3607_v9  ;;  %v778_v63 = vld [vmem:[#allocation13 + $0x170] sm:$0xff]  ;;  %v783_v0 = vld [vmem:[#allocation13 + $0x198] sm:$0xff]  ;;  %v386_v3 = vld [vmem:[%s3888_s21 + $0x30] sm:$0xff]  ;;  %v3999_v4 = vpack.c.bf16 %v784_v54, %v780_v53  ;;  %v4003_v5 = vpack.c.bf16 %v793_v60, %v789_v56  ;;  %v460_v38 = vsub.s32 1, %v455_v32  ;;  %v468_v44 = vsub.s32 3, %v455_v32 }
  0xed   : > { %2511 = vmatprep.subr.bf16.mxu0 %v3928_v59  ;;  %658 = vmatmul.mubr.f32.gmra.mrb[2].mxu1 %v381_v57  ;;  %v3993_v57 = vpack.c.bf16 %v779_v48, %v775_v45  ;;  %v787_v2 = vld [vmem:[#allocation13 + $0x1b8] sm:$0xff]  ;;  %v788_v10 = vld [vmem:[#allocation13 + $0x1c0] sm:$0xff]  ;;  %v782_v14 = vld [vmem:[#allocation13 + $0x190] sm:$0xff] }
  0xee   : > { %663 = vmatprep.mubr.f32.mxu1 %v3607_v9  ;;  %2541 = vmatpush1.bf16.msra.mxu1 %v3945_v12  ;;  %v792_v11 = vld [vmem:[#allocation13 + $0x1e0] sm:$0xff]  ;;  %v4008_v13 = vpack.c.bf16 %v787_v2, %v783_v0  ;;  %v786_v16 = vld [vmem:[#allocation13 + $0x1b0] sm:$0xff]  ;;  %v791_v17 = vld [vmem:[#allocation13 + $0x1d8] sm:$0xff] }
  0xef   : > { %551 = vmatmul.mubr.f32.gmra.mrb[4].mxu0 %v382_v6  ;;  %2543 = vmatprep.subr.bf16.mxu1 %v3948_v15  ;;  %v795_v18 = vld [vmem:[#allocation13 + $0x1f8] sm:$0xff]  ;;  %v387_v19 = vld [vmem:[%s3888_s21 + $0x38] sm:$0xff]  ;;  %v4018_v23 = vpack.c.bf16 %v786_v16, %v782_v14  ;;  %v790_v26 = vld [vmem:[#allocation13 + $0x1d0] sm:$0xff] }
  0xf0   : > { %2513 = vmatpush1.bf16.msra.mxu0 %v3939_v7  ;;  %556 = vmatprep.mubr.f32.mxu0 %v3607_v9  ;;  %v4021_v24 = vpack.c.bf16 %v795_v18, %v791_v17  ;;  %v794_v27 = vld [vmem:[#allocation13 + $0x1f0] sm:$0xff]  ;;  %v796_v30 = vld [vmem:[#allocation2] sm:$0xff] }
  0xf1   : > { %2515 = vmatprep.subr.bf16.mxu0 %v3943_v8  ;;  %664 = vmatmul.mubr.f32.gmra.mrb[4].mxu1 %v382_v6  ;;  %v4005_v6 = vpack.c.bf16 %v778_v63, %v774_v61  ;;  %v4027_v29 = vpack.c.bf16 %v794_v27, %v790_v26  ;;  %v452_v36 = vld [vmem:[#allocation14] sm:$0xf]  ;;  %v464_v63 = vsub.s32 2, %v455_v32  ;;  %v797_v26 = vld [vmem:[#allocation3] sm:$0xff] }
  0xf2   : > { %669 = vmatprep.mubr.f32.mxu1 %v3607_v9  ;;  %2545 = vmatpush1.bf16.msra.mxu1 %v3960_v25  ;;  %v4070_v41 = vrot.slane %v452_v36, %v460_v38  ;;  %v4074_v60 = vrot.slane %v452_v36, %v468_v44 }
  0xf3   : > { %557 = vmatmul.mubr.f32.gmra.mrb[6].mxu0 %v383_v20  ;;  %2547 = vmatprep.subr.bf16.mxu1 %v3963_v28  ;;  %v4077_v2 = vrot.slane %v452_v36, %v464_v63 }
  0xf4   : > { %562 = vmatprep.mubr.f32.mxu0 %v3607_v9  ;;  %2517 = vmatpush1.bf16.msra.mxu0 %v3954_v21 }
  0xf5   : > { %2519 = vmatprep.subr.bf16.mxu0 %v3958_v22  ;;  %670 = vmatmul.mubr.f32.gmra.mrb[6].mxu1 %v383_v20  ;;  %v4014_v20 = vpack.c.bf16 %v792_v11, %v788_v10 }
  0xf6   : > { %675 = vmatprep.mubr.f32.mxu1 %v3607_v9  ;;  %2549 = vmatpush1.bf16.msra.mxu1 %v3975_v39 }
  0xf7   : > { %563 = vmatmul.mubr.f32.gmra.mrb[8].mxu0 %v384_v33  ;;  %2551 = vmatprep.subr.bf16.mxu1 %v3978_v42 }
  0xf8   : > { %568 = vmatprep.mubr.f32.mxu0 %v3607_v9  ;;  %2521 = vmatpush1.bf16.msra.mxu0 %v3969_v34 }
  0xf9   : > { %2523 = vmatprep.subr.bf16.mxu0 %v3973_v35  ;;  %676 = vmatmul.mubr.f32.gmra.mrb[8].mxu1 %v384_v33  ;;  %v456_v33 = vsub.s32 0, %v455_v32 }
  0xfa   : > { %681 = vmatprep.mubr.f32.mxu1 %v3607_v9  ;;  %2553 = vmatpush1.bf16.msra.mxu1 %v3990_v55 }
  0xfb   : > { %569 = vmatmul.mubr.f32.gmra.mrb[10].mxu0 %v385_v49  ;;  %2555 = vmatprep.subr.bf16.mxu1 %v3993_v57  ;;  %v4068_v40 = vrot.slane %v452_v36, %v456_v33 }
  0xfc   : > { %574 = vmatprep.mubr.f32.mxu0 %v3607_v9  ;;  %2525 = vmatpush1.bf16.msra.mxu0 %v3984_v50 }
  0xfd   : > { %2527 = vmatprep.subr.bf16.mxu0 %v3988_v52  ;;  %682 = vmatmul.mubr.f32.gmra.mrb[10].mxu1 %v385_v49 }
  0xfe   : > { %687 = vmatprep.mubr.f32.mxu1 %v3607_v9  ;;  %2557 = vmatpush1.bf16.msra.mxu1 %v4005_v6 }
  0xff   : > { %575 = vmatmul.mubr.f32.gmra.mrb[12].mxu0 %v386_v3  ;;  %2559 = vmatprep.subr.bf16.mxu1 %v4008_v13 }
 0x100   : > { %580 = vmatprep.mubr.f32.mxu0 %v3607_v9  ;;  %2529 = vmatpush1.bf16.msra.mxu0 %v3999_v4 }
 0x101   : > { %2531 = vmatprep.subr.bf16.mxu0 %v4003_v5  ;;  %688 = vmatmul.mubr.f32.gmra.mrb[12].mxu1 %v386_v3 }
 0x102   : > { %693 = vmatprep.mubr.f32.mxu1 %v3607_v9  ;;  %2561 = vmatpush1.bf16.msra.mxu1 %v4018_v23 }
 0x103   : > { %581 = vmatmul.mubr.f32.gmra.mrb[14].mxu0 %v387_v19  ;;  %2563 = vmatprep.subr.bf16.mxu1 %v4021_v24 }
 0x104   : > { %2533 = vmatpush1.bf16.msra.mxu0 %v4014_v20  ;;  %867 = vmatprep.mubr.f32.mxu0 %v3607_v9 }
 0x105   : > { %2567 = vmatprep.subr.bf16.mxu0 %v3912_v37  ;;  %694 = vmatmul.mubr.f32.gmra.mrb[14].mxu1 %v387_v19 }
 0x106   : > { %938 = vmatprep.mubr.f32.mxu1 %v3607_v9  ;;  %2565 = vmatpush1.bf16.msra.mxu1 %v4027_v29 }
 0x107   : > { %2599 = vmatprep.subr.bf16.mxu1 %v3920_v51 }
 0x10b   : > { %868 = vmatmul.mubr.f32.vlgmr.msra.gmra.mrb[14].mxu0 %v796_v30 }
 0x10c   : > { %2569 = vmatpush1.bf16.msra.mxu0 %v3915_v46  ;;  %1044 = vmatprep.mubr.f32.mxu0 %v3607_v9 }
 0x10d   : > { %2571 = vmatprep.subr.bf16.mxu0 %v3918_v47  ;;  %939 = vmatmul.mubr.f32.vlgmr.msra.gmra.mrb[14].mxu1 %v796_v30 }
 0x10e   : > { %2601 = vmatpush1.bf16.msra.mxu1 %v3931_v62  ;;  %1115 = vmatprep.mubr.f32.mxu1 %v3607_v9 }
 0x10f   : > { %2603 = vmatprep.subr.bf16.mxu1 %v3933_v1 }
 0x110   : > { %2573 = vmatpush1.bf16.msra.mxu0 %v3925_v58 }
 0x111   : > { %2575 = vmatprep.subr.bf16.mxu0 %v3928_v59 }
 0x112   : > { %2605 = vmatpush1.bf16.msra.mxu1 %v3945_v12 }
 0x113   : > { %2607 = vmatprep.subr.bf16.mxu1 %v3948_v15 }
 0x114   : > { %2577 = vmatpush1.bf16.msra.mxu0 %v3939_v7 }
 0x115   : > { %2579 = vmatprep.subr.bf16.mxu0 %v3943_v8 }
 0x116   : > { %2609 = vmatpush1.bf16.msra.mxu1 %v3960_v25 }
 0x117   : > { %2611 = vmatprep.subr.bf16.mxu1 %v3963_v28 }
 0x118   : > { %2581 = vmatpush1.bf16.msra.mxu0 %v3954_v21 }
 0x119   : > { %2583 = vmatprep.subr.bf16.mxu0 %v3958_v22 }
 0x11a   : > { %2613 = vmatpush1.bf16.msra.mxu1 %v3975_v39 }
 0x11b   : > { %2615 = vmatprep.subr.bf16.mxu1 %v3978_v42 }
 0x11c   : > { %2585 = vmatpush1.bf16.msra.mxu0 %v3969_v34 }
 0x11d   : > { %2587 = vmatprep.subr.bf16.mxu0 %v3973_v35 }
 0x11e   : > { %2617 = vmatpush1.bf16.msra.mxu1 %v3990_v55 }
 0x11f   : > { %2619 = vmatprep.subr.bf16.mxu1 %v3993_v57 }
 0x120   : > { %2589 = vmatpush1.bf16.msra.mxu0 %v3984_v50 }
 0x121   : > { %2591 = vmatprep.subr.bf16.mxu0 %v3988_v52 }
 0x122   : > { %2621 = vmatpush1.bf16.msra.mxu1 %v4005_v6 }
 0x123   : > { %2623 = vmatprep.subr.bf16.mxu1 %v4008_v13 }
 0x124   : > { %2593 = vmatpush1.bf16.msra.mxu0 %v3999_v4 }
 0x125   : > { %2595 = vmatprep.subr.bf16.mxu0 %v4003_v5 }
 0x126   : > { %2625 = vmatpush1.bf16.msra.mxu1 %v4018_v23 }
 0x127   : > { %2627 = vmatprep.subr.bf16.mxu1 %v4021_v24 }
 0x128   : > { %2597 = vmatpush1.bf16.msra.mxu0 %v4014_v20 }
 0x129   : > { %2631 = vmatprep.subr.bf16.mxu0 %v3912_v37 }
 0x12a   : > { %2629 = vmatpush1.bf16.msra.mxu1 %v4027_v29 }
 0x12b   : > { %2663 = vmatprep.subr.bf16.mxu1 %v3920_v51 }
 0x1de   : > { %v869_v43 = vpop.f32.mrb[14].mxu0 }
 0x1df   : > { %v3028_v45 = vadd.f32 %v869_v43, %v4068_v40  ;;  %v871_v48 = vpop.f32.mrb[15].mxu0 }
 0x1e0   : > { %v3029_v49 = vadd.f32 %v871_v48, %v4070_v41  ;;  %v940_v54 = vpop.f32.mrb[14].mxu1 }
 0x1e1   : > { %v2397_v53 = vmul.f32 -1.442695, %v3028_v45  ;;  %v942_v61 = vpop.f32.mrb[15].mxu1  ;;  %v3044_v10 = vadd.f32 %v940_v54, %v4077_v2 }
 0x1e2   : > { %v2398_v56 = vmul.f32 -1.442695, %v3029_v49  ;;  %v3045_v0 = vadd.f32 %v942_v61, %v4074_v60 }
 0x1e3   : > { %3189 = vpow2.f32 %v2397_v53 }
 0x1e4   : > { %3191 = vpow2.f32 %v2398_v56  ;;  %v2399_v3 = vmul.f32 -1.442695, %v3045_v0 }
 0x1e6   : > { %3193 = vpow2.f32 %v2399_v3 }
 0x1e7   : > { %3195 = vtanh.f32 %v3044_v10 }
 0x1ed   : > { %v3190_v11 = vpop.eup %3189 }
 0x1ee   : > { %v3192_v14 = vpop.eup %3191  ;;  %v952_v16 = vadd.f32 1.0, %v3190_v11 }
 0x1ef   : > { %v958_v17 = vadd.f32 1.0, %v3192_v14 }
 0x1f0   : > { %3197 = vrcp.f32 %v952_v16  ;;  %v3194_v18 = vpop.eup %3193 }
 0x1f1   : > { %3199 = vrcp.f32 %v958_v17  ;;  %v3196_v19 = vpop.eup %3195  ;;  %v965_v32 = vadd.f32 1.0, %v3194_v18 }
 0x1f3   : > { %3201 = vrcp.f32 %v965_v32 }
 0x1fa   : > { %v3198_v27 = vpop.eup %3197 }
 0x1fb   : > { %v3200_v30 = vpop.eup %3199  ;;  %v969_v31 = vmul.f32 %v3198_v27, %v3196_v19 }
 0x1fc   : > { %v968_v33 = vmul.f32 %v3200_v30, %v797_v26 }
 0x1fd   : > { %v3202_v38 = vpop.eup %3201 }
 0x1fe   : > { %v4080_v36 = vadd.f32 %v969_v31, %v968_v33 }
 0x200   : > { %3203 = vtanh.f32 %v4080_v36 }
 0x20a   : > { %v3204_v43 = vpop.eup %3203 }
 0x20b   : > { %v972_v44 = vmul.f32 %v3204_v43, %v3202_v38 }
 0x20d   : > { %2400 = vst [vmem:[%s3906_s8 + $0x38] sm:$0xff] %v972_v44  ;;  %1045 = vmatmul.mubr.f32.vlgmr.msra.gmra.mrb[12].mxu0 %v972_v44  ;;  %1116 = vmatmul.mubr.f32.vlgmr.msra.gmra.mrb[12].mxu1 %v972_v44 }
 0x20e   : > { %2633 = vmatpush1.bf16.msra.mxu0 %v3915_v46  ;;  %2665 = vmatpush1.bf16.msra.mxu1 %v3931_v62 }
 0x20f   : > { %2635 = vmatprep.subr.bf16.mxu0 %v3918_v47  ;;  %2667 = vmatprep.subr.bf16.mxu1 %v3933_v1 }
 0x210   : > { %1221 = vmatprep.mubr.f32.mxu0 %v3607_v9  ;;  %1292 = vmatprep.mubr.f32.mxu1 %v3607_v9 }
 0x212   : > { %2637 = vmatpush1.bf16.msra.mxu0 %v3925_v58  ;;  %2669 = vmatpush1.bf16.msra.mxu1 %v3945_v12 }
 0x213   : > { %2639 = vmatprep.subr.bf16.mxu0 %v3928_v59  ;;  %2671 = vmatprep.subr.bf16.mxu1 %v3948_v15 }
 0x216   : > { %2641 = vmatpush1.bf16.msra.mxu0 %v3939_v7  ;;  %2673 = vmatpush1.bf16.msra.mxu1 %v3960_v25 }
 0x217   : > { %2643 = vmatprep.subr.bf16.mxu0 %v3943_v8  ;;  %2675 = vmatprep.subr.bf16.mxu1 %v3963_v28 }
 0x21a   : > { %2645 = vmatpush1.bf16.msra.mxu0 %v3954_v21  ;;  %2677 = vmatpush1.bf16.msra.mxu1 %v3975_v39 }
 0x21b   : > { %2647 = vmatprep.subr.bf16.mxu0 %v3958_v22  ;;  %2679 = vmatprep.subr.bf16.mxu1 %v3978_v42 }
 0x21e   : > { %2649 = vmatpush1.bf16.msra.mxu0 %v3969_v34  ;;  %2681 = vmatpush1.bf16.msra.mxu1 %v3990_v55 }
 0x21f   : > { %2651 = vmatprep.subr.bf16.mxu0 %v3973_v35  ;;  %2683 = vmatprep.subr.bf16.mxu1 %v3993_v57 }
 0x222   : > { %2653 = vmatpush1.bf16.msra.mxu0 %v3984_v50  ;;  %2685 = vmatpush1.bf16.msra.mxu1 %v4005_v6 }
 0x223   : > { %2655 = vmatprep.subr.bf16.mxu0 %v3988_v52  ;;  %2687 = vmatprep.subr.bf16.mxu1 %v4008_v13 }
 0x226   : > { %2657 = vmatpush1.bf16.msra.mxu0 %v3999_v4  ;;  %2689 = vmatpush1.bf16.msra.mxu1 %v4018_v23 }
 0x227   : > { %2659 = vmatprep.subr.bf16.mxu0 %v4003_v5  ;;  %2691 = vmatprep.subr.bf16.mxu1 %v4021_v24 }
 0x22a   : > { %2661 = vmatpush1.bf16.msra.mxu0 %v4014_v20  ;;  %2693 = vmatpush1.bf16.msra.mxu1 %v4027_v29 }
 0x22b   : > { %2695 = vmatprep.subr.bf16.mxu0 %v3912_v37  ;;  %2727 = vmatprep.subr.bf16.mxu1 %v3920_v51 }
 0x2e0   : > { %v1046_v45 = vpop.f32.mrb[12].mxu0  ;;  %v1117_v48 = vpop.f32.mrb[12].mxu1 }
 0x2e1   : > { %v3026_v49 = vadd.f32 %v1046_v45, %v4068_v40  ;;  %v1048_v53 = vpop.f32.mrb[13].mxu0  ;;  %v1119_v54 = vpop.f32.mrb[13].mxu1  ;;  %v3042_v10 = vadd.f32 %v1117_v48, %v4077_v2 }
 0x2e2   : > { %v3027_v56 = vadd.f32 %v1048_v53, %v4070_v41  ;;  %v3043_v0 = vadd.f32 %v1119_v54, %v4074_v60 }
 0x2e3   : > { %v2401_v61 = vmul.f32 -1.442695, %v3026_v49 }
 0x2e4   : > { %v2402_v63 = vmul.f32 -1.442695, %v3027_v56  ;;  %v2403_v3 = vmul.f32 -1.442695, %v3043_v0 }
 0x2e5   : > { %3205 = vpow2.f32 %v2401_v61 }
 0x2e6   : > { %3207 = vpow2.f32 %v2402_v63 }
 0x2e7   : > { %3209 = vpow2.f32 %v2403_v3 }
 0x2e8   : > { %3211 = vtanh.f32 %v3042_v10 }
 0x2ef   : > { %v3206_v11 = vpop.eup %3205 }
 0x2f0   : > { %v3208_v14 = vpop.eup %3207  ;;  %v1129_v16 = vadd.f32 1.0, %v3206_v11 }
 0x2f1   : > { %v1135_v17 = vadd.f32 1.0, %v3208_v14  ;;  %v3210_v18 = vpop.eup %3209 }
 0x2f2   : > { %3213 = vrcp.f32 %v1129_v16  ;;  %v3212_v19 = vpop.eup %3211  ;;  %v1142_v31 = vadd.f32 1.0, %v3210_v18 }
 0x2f3   : > { %3215 = vrcp.f32 %v1135_v17 }
 0x2f4   : > { %3217 = vrcp.f32 %v1142_v31 }
 0x2fc   : > { %v3214_v26 = vpop.eup %3213 }
 0x2fd   : > { %v3216_v27 = vpop.eup %3215  ;;  %v1146_v30 = vmul.f32 %v3214_v26, %v3212_v19 }
 0x2fe   : > { %v1145_v32 = vmul.f32 %v3216_v27, %v4080_v36  ;;  %v3218_v38 = vpop.eup %3217 }
 0x300   : > { %v4123_v33 = vadd.f32 %v1146_v30, %v1145_v32 }
 0x302   : > { %3219 = vtanh.f32 %v4123_v33 }
 0x30c   : > { %v3220_v43 = vpop.eup %3219 }
 0x30d   : > { %v1149_v44 = vmul.f32 %v3220_v43, %v3218_v38 }
 0x30f   : > { %2404 = vst [vmem:[%s3906_s8 + $0x30] sm:$0xff] %v1149_v44  ;;  %1222 = vmatmul.mubr.f32.vlgmr.msra.gmra.mrb[10].mxu0 %v1149_v44  ;;  %1293 = vmatmul.mubr.f32.vlgmr.msra.gmra.mrb[10].mxu1 %v1149_v44 }
 0x310   : > { %2697 = vmatpush1.bf16.msra.mxu0 %v3915_v46  ;;  %2729 = vmatpush1.bf16.msra.mxu1 %v3931_v62 }
 0x311   : > { %2699 = vmatprep.subr.bf16.mxu0 %v3918_v47  ;;  %2731 = vmatprep.subr.bf16.mxu1 %v3933_v1 }
 0x312   : > { %1398 = vmatprep.mubr.f32.mxu0 %v3607_v9  ;;  %1469 = vmatprep.mubr.f32.mxu1 %v3607_v9 }
 0x314   : > { %2701 = vmatpush1.bf16.msra.mxu0 %v3925_v58  ;;  %2733 = vmatpush1.bf16.msra.mxu1 %v3945_v12 }
 0x315   : > { %2703 = vmatprep.subr.bf16.mxu0 %v3928_v59  ;;  %2735 = vmatprep.subr.bf16.mxu1 %v3948_v15 }
 0x318   : > { %2705 = vmatpush1.bf16.msra.mxu0 %v3939_v7  ;;  %2737 = vmatpush1.bf16.msra.mxu1 %v3960_v25 }
 0x319   : > { %2707 = vmatprep.subr.bf16.mxu0 %v3943_v8  ;;  %2739 = vmatprep.subr.bf16.mxu1 %v3963_v28 }
 0x31c   : > { %2709 = vmatpush1.bf16.msra.mxu0 %v3954_v21  ;;  %2741 = vmatpush1.bf16.msra.mxu1 %v3975_v39 }
 0x31d   : > { %2711 = vmatprep.subr.bf16.mxu0 %v3958_v22  ;;  %2743 = vmatprep.subr.bf16.mxu1 %v3978_v42 }
 0x320   : > { %2713 = vmatpush1.bf16.msra.mxu0 %v3969_v34  ;;  %2745 = vmatpush1.bf16.msra.mxu1 %v3990_v55 }
 0x321   : > { %2715 = vmatprep.subr.bf16.mxu0 %v3973_v35  ;;  %2747 = vmatprep.subr.bf16.mxu1 %v3993_v57 }
 0x324   : > { %2717 = vmatpush1.bf16.msra.mxu0 %v3984_v50  ;;  %2749 = vmatpush1.bf16.msra.mxu1 %v4005_v6 }
 0x325   : > { %2719 = vmatprep.subr.bf16.mxu0 %v3988_v52  ;;  %2751 = vmatprep.subr.bf16.mxu1 %v4008_v13 }
 0x328   : > { %2721 = vmatpush1.bf16.msra.mxu0 %v3999_v4  ;;  %2753 = vmatpush1.bf16.msra.mxu1 %v4018_v23 }
 0x329   : > { %2723 = vmatprep.subr.bf16.mxu0 %v4003_v5  ;;  %2755 = vmatprep.subr.bf16.mxu1 %v4021_v24 }
 0x32c   : > { %2725 = vmatpush1.bf16.msra.mxu0 %v4014_v20  ;;  %2757 = vmatpush1.bf16.msra.mxu1 %v4027_v29 }
 0x32d   : > { %2759 = vmatprep.subr.bf16.mxu0 %v3912_v37  ;;  %2791 = vmatprep.subr.bf16.mxu1 %v3920_v51 }
 0x3e2   : > { %v1223_v36 = vpop.f32.mrb[10].mxu0  ;;  %v1294_v45 = vpop.f32.mrb[10].mxu1 }
 0x3e3   : > { %v3024_v48 = vadd.f32 %v1223_v36, %v4068_v40  ;;  %v1225_v49 = vpop.f32.mrb[11].mxu0  ;;  %v1296_v53 = vpop.f32.mrb[11].mxu1  ;;  %v3040_v3 = vadd.f32 %v1294_v45, %v4077_v2 }
 0x3e4   : > { %v3025_v54 = vadd.f32 %v1225_v49, %v4070_v41  ;;  %v3041_v63 = vadd.f32 %v1296_v53, %v4074_v60 }
 0x3e5   : > { %v2405_v56 = vmul.f32 -1.442695, %v3024_v48 }
 0x3e6   : > { %v2406_v61 = vmul.f32 -1.442695, %v3025_v54  ;;  %v2407_v0 = vmul.f32 -1.442695, %v3041_v63 }
 0x3e7   : > { %3221 = vpow2.f32 %v2405_v56 }
 0x3e8   : > { %3223 = vpow2.f32 %v2406_v61 }
 0x3e9   : > { %3225 = vpow2.f32 %v2407_v0 }
 0x3ea   : > { %3227 = vtanh.f32 %v3040_v3 }
 0x3f1   : > { %v3222_v10 = vpop.eup %3221 }
 0x3f2   : > { %v3224_v11 = vpop.eup %3223  ;;  %v1306_v14 = vadd.f32 1.0, %v3222_v10 }
 0x3f3   : > { %v1312_v16 = vadd.f32 1.0, %v3224_v11  ;;  %v3226_v17 = vpop.eup %3225 }
 0x3f4   : > { %3229 = vrcp.f32 %v1306_v14  ;;  %v3228_v18 = vpop.eup %3227  ;;  %v1319_v30 = vadd.f32 1.0, %v3226_v17 }
 0x3f5   : > { %3231 = vrcp.f32 %v1312_v16 }
 0x3f6   : > { %3233 = vrcp.f32 %v1319_v30 }
 0x3fe   : > { %v3230_v19 = vpop.eup %3229 }
 0x3ff   : > { %v3232_v26 = vpop.eup %3231  ;;  %v1323_v27 = vmul.f32 %v3230_v19, %v3228_v18 }
 0x400   : > { %v1322_v31 = vmul.f32 %v3232_v26, %v4123_v33  ;;  %v3234_v38 = vpop.eup %3233 }
 0x402   : > { %v4166_v32 = vadd.f32 %v1323_v27, %v1322_v31 }
 0x404   : > { %3235 = vtanh.f32 %v4166_v32 }
 0x40e   : > { %v3236_v43 = vpop.eup %3235 }
 0x40f   : > { %v1326_v44 = vmul.f32 %v3236_v43, %v3234_v38 }
 0x411   : > { %2408 = vst [vmem:[%s3906_s8 + $0x28] sm:$0xff] %v1326_v44  ;;  %1399 = vmatmul.mubr.f32.vlgmr.msra.gmra.mrb[8].mxu0 %v1326_v44  ;;  %1470 = vmatmul.mubr.f32.vlgmr.msra.gmra.mrb[8].mxu1 %v1326_v44 }
 0x412   : > { %2761 = vmatpush1.bf16.msra.mxu0 %v3915_v46  ;;  %2793 = vmatpush1.bf16.msra.mxu1 %v3931_v62 }
 0x413   : > { %2763 = vmatprep.subr.bf16.mxu0 %v3918_v47  ;;  %2795 = vmatprep.subr.bf16.mxu1 %v3933_v1 }
 0x414   : > { %1575 = vmatprep.mubr.f32.mxu0 %v3607_v9  ;;  %1646 = vmatprep.mubr.f32.mxu1 %v3607_v9 }
 0x416   : > { %2765 = vmatpush1.bf16.msra.mxu0 %v3925_v58  ;;  %2797 = vmatpush1.bf16.msra.mxu1 %v3945_v12 }
 0x417   : > { %2767 = vmatprep.subr.bf16.mxu0 %v3928_v59  ;;  %2799 = vmatprep.subr.bf16.mxu1 %v3948_v15 }
 0x41a   : > { %2769 = vmatpush1.bf16.msra.mxu0 %v3939_v7  ;;  %2801 = vmatpush1.bf16.msra.mxu1 %v3960_v25 }
 0x41b   : > { %2771 = vmatprep.subr.bf16.mxu0 %v3943_v8  ;;  %2803 = vmatprep.subr.bf16.mxu1 %v3963_v28 }
 0x41e   : > { %2773 = vmatpush1.bf16.msra.mxu0 %v3954_v21  ;;  %2805 = vmatpush1.bf16.msra.mxu1 %v3975_v39 }
 0x41f   : > { %2775 = vmatprep.subr.bf16.mxu0 %v3958_v22  ;;  %2807 = vmatprep.subr.bf16.mxu1 %v3978_v42 }
 0x422   : > { %2777 = vmatpush1.bf16.msra.mxu0 %v3969_v34  ;;  %2809 = vmatpush1.bf16.msra.mxu1 %v3990_v55 }
 0x423   : > { %2779 = vmatprep.subr.bf16.mxu0 %v3973_v35  ;;  %2811 = vmatprep.subr.bf16.mxu1 %v3993_v57 }
 0x426   : > { %2781 = vmatpush1.bf16.msra.mxu0 %v3984_v50  ;;  %2813 = vmatpush1.bf16.msra.mxu1 %v4005_v6 }
 0x427   : > { %2783 = vmatprep.subr.bf16.mxu0 %v3988_v52  ;;  %2815 = vmatprep.subr.bf16.mxu1 %v4008_v13 }
 0x42a   : > { %2785 = vmatpush1.bf16.msra.mxu0 %v3999_v4  ;;  %2817 = vmatpush1.bf16.msra.mxu1 %v4018_v23 }
 0x42b   : > { %2787 = vmatprep.subr.bf16.mxu0 %v4003_v5  ;;  %2819 = vmatprep.subr.bf16.mxu1 %v4021_v24 }
 0x42e   : > { %2789 = vmatpush1.bf16.msra.mxu0 %v4014_v20  ;;  %2821 = vmatpush1.bf16.msra.mxu1 %v4027_v29 }
 0x42f   : > { %2823 = vmatprep.subr.bf16.mxu0 %v3912_v37  ;;  %2855 = vmatprep.subr.bf16.mxu1 %v3920_v51 }
 0x4e4   : > { %v1400_v33 = vpop.f32.mrb[8].mxu0  ;;  %v1471_v36 = vpop.f32.mrb[8].mxu1 }
 0x4e5   : > { %v3022_v45 = vadd.f32 %v1400_v33, %v4068_v40  ;;  %v1402_v48 = vpop.f32.mrb[9].mxu0  ;;  %v1473_v49 = vpop.f32.mrb[9].mxu1  ;;  %v3038_v0 = vadd.f32 %v1471_v36, %v4077_v2 }
 0x4e6   : > { %v3023_v53 = vadd.f32 %v1402_v48, %v4070_v41  ;;  %v3039_v61 = vadd.f32 %v1473_v49, %v4074_v60 }
 0x4e7   : > { %v2409_v54 = vmul.f32 -1.442695, %v3022_v45 }
 0x4e8   : > { %v2410_v56 = vmul.f32 -1.442695, %v3023_v53  ;;  %v2411_v63 = vmul.f32 -1.442695, %v3039_v61 }
 0x4e9   : > { %3237 = vpow2.f32 %v2409_v54 }
 0x4ea   : > { %3239 = vpow2.f32 %v2410_v56 }
 0x4eb   : > { %3241 = vpow2.f32 %v2411_v63 }
 0x4ec   : > { %3243 = vtanh.f32 %v3038_v0 }
 0x4f3   : > { %v3238_v3 = vpop.eup %3237 }
 0x4f4   : > { %v3240_v10 = vpop.eup %3239  ;;  %v1483_v11 = vadd.f32 1.0, %v3238_v3 }
 0x4f5   : > { %v1489_v14 = vadd.f32 1.0, %v3240_v10  ;;  %v3242_v16 = vpop.eup %3241 }
 0x4f6   : > { %3245 = vrcp.f32 %v1483_v11  ;;  %v3244_v17 = vpop.eup %3243  ;;  %v1496_v27 = vadd.f32 1.0, %v3242_v16 }
 0x4f7   : > { %3247 = vrcp.f32 %v1489_v14 }
 0x4f8   : > { %3249 = vrcp.f32 %v1496_v27 }
 0x500   : > { %v3246_v18 = vpop.eup %3245 }
 0x501   : > { %v3248_v19 = vpop.eup %3247  ;;  %v1500_v26 = vmul.f32 %v3246_v18, %v3244_v17 }
 0x502   : > { %v1499_v30 = vmul.f32 %v3248_v19, %v4166_v32  ;;  %v3250_v38 = vpop.eup %3249 }
 0x504   : > { %v4209_v31 = vadd.f32 %v1500_v26, %v1499_v30 }
 0x506   : > { %3251 = vtanh.f32 %v4209_v31 }
 0x510   : > { %v3252_v43 = vpop.eup %3251 }
 0x511   : > { %v1503_v44 = vmul.f32 %v3252_v43, %v3250_v38 }
 0x513   : > { %2412 = vst [vmem:[%s3906_s8 + $0x20] sm:$0xff] %v1503_v44  ;;  %1576 = vmatmul.mubr.f32.vlgmr.msra.gmra.mrb[6].mxu0 %v1503_v44  ;;  %1647 = vmatmul.mubr.f32.vlgmr.msra.gmra.mrb[6].mxu1 %v1503_v44 }
 0x514   : > { %2825 = vmatpush1.bf16.msra.mxu0 %v3915_v46  ;;  %2857 = vmatpush1.bf16.msra.mxu1 %v3931_v62 }
 0x515   : > { %2827 = vmatprep.subr.bf16.mxu0 %v3918_v47  ;;  %2859 = vmatprep.subr.bf16.mxu1 %v3933_v1 }
 0x516   : > { %1752 = vmatprep.mubr.f32.mxu0 %v3607_v9  ;;  %1823 = vmatprep.mubr.f32.mxu1 %v3607_v9 }
 0x518   : > { %2829 = vmatpush1.bf16.msra.mxu0 %v3925_v58  ;;  %2861 = vmatpush1.bf16.msra.mxu1 %v3945_v12 }
 0x519   : > { %2831 = vmatprep.subr.bf16.mxu0 %v3928_v59  ;;  %2863 = vmatprep.subr.bf16.mxu1 %v3948_v15 }
 0x51c   : > { %2833 = vmatpush1.bf16.msra.mxu0 %v3939_v7  ;;  %2865 = vmatpush1.bf16.msra.mxu1 %v3960_v25 }
 0x51d   : > { %2835 = vmatprep.subr.bf16.mxu0 %v3943_v8  ;;  %2867 = vmatprep.subr.bf16.mxu1 %v3963_v28 }
 0x520   : > { %2837 = vmatpush1.bf16.msra.mxu0 %v3954_v21  ;;  %2869 = vmatpush1.bf16.msra.mxu1 %v3975_v39 }
 0x521   : > { %2839 = vmatprep.subr.bf16.mxu0 %v3958_v22  ;;  %2871 = vmatprep.subr.bf16.mxu1 %v3978_v42 }
 0x524   : > { %2841 = vmatpush1.bf16.msra.mxu0 %v3969_v34  ;;  %2873 = vmatpush1.bf16.msra.mxu1 %v3990_v55 }
 0x525   : > { %2843 = vmatprep.subr.bf16.mxu0 %v3973_v35  ;;  %2875 = vmatprep.subr.bf16.mxu1 %v3993_v57 }
 0x528   : > { %2845 = vmatpush1.bf16.msra.mxu0 %v3984_v50  ;;  %2877 = vmatpush1.bf16.msra.mxu1 %v4005_v6 }
 0x529   : > { %2847 = vmatprep.subr.bf16.mxu0 %v3988_v52  ;;  %2879 = vmatprep.subr.bf16.mxu1 %v4008_v13 }
 0x52c   : > { %2849 = vmatpush1.bf16.msra.mxu0 %v3999_v4  ;;  %2881 = vmatpush1.bf16.msra.mxu1 %v4018_v23 }
 0x52d   : > { %2851 = vmatprep.subr.bf16.mxu0 %v4003_v5  ;;  %2883 = vmatprep.subr.bf16.mxu1 %v4021_v24 }
 0x530   : > { %2853 = vmatpush1.bf16.msra.mxu0 %v4014_v20  ;;  %2885 = vmatpush1.bf16.msra.mxu1 %v4027_v29 }
 0x531   : > { %2887 = vmatprep.subr.bf16.mxu0 %v3912_v37  ;;  %2919 = vmatprep.subr.bf16.mxu1 %v3920_v51 }
 0x5e6   : > { %v1577_v32 = vpop.f32.mrb[6].mxu0  ;;  %v1648_v33 = vpop.f32.mrb[6].mxu1 }
 0x5e7   : > { %v3020_v36 = vadd.f32 %v1577_v32, %v4068_v40  ;;  %v1579_v45 = vpop.f32.mrb[7].mxu0  ;;  %v1650_v48 = vpop.f32.mrb[7].mxu1  ;;  %v3036_v63 = vadd.f32 %v1648_v33, %v4077_v2 }
 0x5e8   : > { %v3021_v49 = vadd.f32 %v1579_v45, %v4070_v41  ;;  %v3037_v56 = vadd.f32 %v1650_v48, %v4074_v60 }
 0x5e9   : > { %v2413_v53 = vmul.f32 -1.442695, %v3020_v36 }
 0x5ea   : > { %v2414_v54 = vmul.f32 -1.442695, %v3021_v49  ;;  %v2415_v61 = vmul.f32 -1.442695, %v3037_v56 }
 0x5eb   : > { %3253 = vpow2.f32 %v2413_v53 }
 0x5ec   : > { %3255 = vpow2.f32 %v2414_v54 }
 0x5ed   : > { %3257 = vpow2.f32 %v2415_v61 }
 0x5ee   : > { %3259 = vtanh.f32 %v3036_v63 }
 0x5f5   : > { %v3254_v0 = vpop.eup %3253 }
 0x5f6   : > { %v3256_v3 = vpop.eup %3255  ;;  %v1660_v10 = vadd.f32 1.0, %v3254_v0 }
 0x5f7   : > { %v1666_v11 = vadd.f32 1.0, %v3256_v3  ;;  %v3258_v14 = vpop.eup %3257 }
 0x5f8   : > { %3261 = vrcp.f32 %v1660_v10  ;;  %v3260_v16 = vpop.eup %3259  ;;  %v1673_v26 = vadd.f32 1.0, %v3258_v14 }
 0x5f9   : > { %3263 = vrcp.f32 %v1666_v11 }
 0x5fa   : > { %3265 = vrcp.f32 %v1673_v26 }
 0x602   : > { %v3262_v17 = vpop.eup %3261 }
 0x603   : > { %v3264_v18 = vpop.eup %3263  ;;  %v1677_v19 = vmul.f32 %v3262_v17, %v3260_v16 }
 0x604   : > { %v1676_v27 = vmul.f32 %v3264_v18, %v4209_v31  ;;  %v3266_v38 = vpop.eup %3265 }
 0x606   : > { %v4252_v30 = vadd.f32 %v1677_v19, %v1676_v27 }
 0x608   : > { %3267 = vtanh.f32 %v4252_v30 }
 0x612   : > { %v3268_v43 = vpop.eup %3267 }
 0x613   : > { %v1680_v44 = vmul.f32 %v3268_v43, %v3266_v38 }
 0x615   : > { %2416 = vst [vmem:[%s3906_s8 + $0x18] sm:$0xff] %v1680_v44  ;;  %1753 = vmatmul.mubr.f32.vlgmr.msra.gmra.mrb[4].mxu0 %v1680_v44  ;;  %1824 = vmatmul.mubr.f32.vlgmr.msra.gmra.mrb[4].mxu1 %v1680_v44 }
 0x616   : > { %2889 = vmatpush1.bf16.msra.mxu0 %v3915_v46  ;;  %2921 = vmatpush1.bf16.msra.mxu1 %v3931_v62 }
 0x617   : > { %2891 = vmatprep.subr.bf16.mxu0 %v3918_v47  ;;  %2923 = vmatprep.subr.bf16.mxu1 %v3933_v1 }
 0x618   : > { %1929 = vmatprep.mubr.f32.mxu0 %v3607_v9  ;;  %2000 = vmatprep.mubr.f32.mxu1 %v3607_v9 }
 0x61a   : > { %2893 = vmatpush1.bf16.msra.mxu0 %v3925_v58  ;;  %2925 = vmatpush1.bf16.msra.mxu1 %v3945_v12 }
 0x61b   : > { %2895 = vmatprep.subr.bf16.mxu0 %v3928_v59  ;;  %2927 = vmatprep.subr.bf16.mxu1 %v3948_v15 }
 0x61e   : > { %2897 = vmatpush1.bf16.msra.mxu0 %v3939_v7  ;;  %2929 = vmatpush1.bf16.msra.mxu1 %v3960_v25 }
 0x61f   : > { %2899 = vmatprep.subr.bf16.mxu0 %v3943_v8  ;;  %2931 = vmatprep.subr.bf16.mxu1 %v3963_v28 }
 0x622   : > { %2901 = vmatpush1.bf16.msra.mxu0 %v3954_v21  ;;  %2933 = vmatpush1.bf16.msra.mxu1 %v3975_v39 }
 0x623   : > { %2903 = vmatprep.subr.bf16.mxu0 %v3958_v22  ;;  %2935 = vmatprep.subr.bf16.mxu1 %v3978_v42 }
 0x626   : > { %2905 = vmatpush1.bf16.msra.mxu0 %v3969_v34  ;;  %2937 = vmatpush1.bf16.msra.mxu1 %v3990_v55 }
 0x627   : > { %2907 = vmatprep.subr.bf16.mxu0 %v3973_v35  ;;  %2939 = vmatprep.subr.bf16.mxu1 %v3993_v57 }
 0x62a   : > { %2909 = vmatpush1.bf16.msra.mxu0 %v3984_v50  ;;  %2941 = vmatpush1.bf16.msra.mxu1 %v4005_v6 }
 0x62b   : > { %2911 = vmatprep.subr.bf16.mxu0 %v3988_v52  ;;  %2943 = vmatprep.subr.bf16.mxu1 %v4008_v13 }
 0x62e   : > { %2913 = vmatpush1.bf16.msra.mxu0 %v3999_v4  ;;  %2945 = vmatpush1.bf16.msra.mxu1 %v4018_v23 }
 0x62f   : > { %2915 = vmatprep.subr.bf16.mxu0 %v4003_v5  ;;  %2947 = vmatprep.subr.bf16.mxu1 %v4021_v24 }
 0x632   : > { %2917 = vmatpush1.bf16.msra.mxu0 %v4014_v20  ;;  %2949 = vmatpush1.bf16.msra.mxu1 %v4027_v29 }
 0x633   : > { %2951 = vmatprep.subr.bf16.mxu0 %v3912_v37  ;;  %2983 = vmatprep.subr.bf16.mxu1 %v3920_v51 }
 0x6e8   : > { %v1754_v31 = vpop.f32.mrb[4].mxu0  ;;  %v1825_v32 = vpop.f32.mrb[4].mxu1 }
 0x6e9   : > { %v3018_v33 = vadd.f32 %v1754_v31, %v4068_v40  ;;  %v1756_v36 = vpop.f32.mrb[5].mxu0  ;;  %v1827_v45 = vpop.f32.mrb[5].mxu1  ;;  %v3034_v61 = vadd.f32 %v1825_v32, %v4077_v2 }
 0x6ea   : > { %v3019_v48 = vadd.f32 %v1756_v36, %v4070_v41  ;;  %v3035_v54 = vadd.f32 %v1827_v45, %v4074_v60 }
 0x6eb   : > { %v2417_v49 = vmul.f32 -1.442695, %v3018_v33 }
 0x6ec   : > { %v2418_v53 = vmul.f32 -1.442695, %v3019_v48  ;;  %v2419_v56 = vmul.f32 -1.442695, %v3035_v54 }
 0x6ed   : > { %3269 = vpow2.f32 %v2417_v49 }
 0x6ee   : > { %3271 = vpow2.f32 %v2418_v53 }
 0x6ef   : > { %3273 = vpow2.f32 %v2419_v56 }
 0x6f0   : > { %3275 = vtanh.f32 %v3034_v61 }
 0x6f7   : > { %v3270_v37 = vpop.eup %3269 }
 0x6f8   : > { %v3272_v63 = vpop.eup %3271  ;;  %v1837_v51 = vadd.f32 1.0, %v3270_v37 }
 0x6f9   : > { %v1843_v0 = vadd.f32 1.0, %v3272_v63  ;;  %v3274_v3 = vpop.eup %3273 }
 0x6fa   : > { %3277 = vrcp.f32 %v1837_v51  ;;  %v3276_v10 = vpop.eup %3275  ;;  %v1850_v17 = vadd.f32 1.0, %v3274_v3 }
 0x6fb   : > { %3279 = vrcp.f32 %v1843_v0 }
 0x6fc   : > { %3281 = vrcp.f32 %v1850_v17 }
 0x704   : > { %v3278_v11 = vpop.eup %3277 }
 0x705   : > { %v3280_v14 = vpop.eup %3279  ;;  %v1854_v16 = vmul.f32 %v3278_v11, %v3276_v10 }
 0x706   : > { %v1853_v18 = vmul.f32 %v3280_v14, %v4252_v30  ;;  %v3282_v26 = vpop.eup %3281 }
 0x708   : > { %v4295_v19 = vadd.f32 %v1854_v16, %v1853_v18 }
 0x70a   : > { %3283 = vtanh.f32 %v4295_v19 }
 0x714   : > { %v3284_v27 = vpop.eup %3283 }
 0x715   : > { %v1857_v38 = vmul.f32 %v3284_v27, %v3282_v26 }
 0x717   : > { %2420 = vst [vmem:[%s3906_s8 + $0x10] sm:$0xff] %v1857_v38  ;;  %1930 = vmatmul.mubr.f32.vlgmr.msra.gmra.mrb[2].mxu0 %v1857_v38  ;;  %2001 = vmatmul.mubr.f32.vlgmr.msra.gmra.mrb[2].mxu1 %v1857_v38 }
 0x718   : > { %2953 = vmatpush1.bf16.msra.mxu0 %v3915_v46  ;;  %2985 = vmatpush1.bf16.msra.mxu1 %v3931_v62 }
 0x719   : > { %2955 = vmatprep.subr.bf16.mxu0 %v3918_v47  ;;  %2987 = vmatprep.subr.bf16.mxu1 %v3933_v1 }
 0x71a   : > { %2105 = vmatprep.mubr.f32.mxu0 %v3607_v9  ;;  %2176 = vmatprep.mubr.f32.mxu1 %v3607_v9 }
 0x71c   : > { %2957 = vmatpush1.bf16.msra.mxu0 %v3925_v58  ;;  %2989 = vmatpush1.bf16.msra.mxu1 %v3945_v12 }
 0x71d   : > { %2959 = vmatprep.subr.bf16.mxu0 %v3928_v59  ;;  %2991 = vmatprep.subr.bf16.mxu1 %v3948_v15 }
 0x720   : > { %2961 = vmatpush1.bf16.msra.mxu0 %v3939_v7  ;;  %2993 = vmatpush1.bf16.msra.mxu1 %v3960_v25 }
 0x721   : > { %2963 = vmatprep.subr.bf16.mxu0 %v3943_v8  ;;  %2995 = vmatprep.subr.bf16.mxu1 %v3963_v28 }
 0x724   : > { %2965 = vmatpush1.bf16.msra.mxu0 %v3954_v21  ;;  %2997 = vmatpush1.bf16.msra.mxu1 %v3975_v39 }
 0x725   : > { %2967 = vmatprep.subr.bf16.mxu0 %v3958_v22  ;;  %2999 = vmatprep.subr.bf16.mxu1 %v3978_v42 }
 0x728   : > { %2969 = vmatpush1.bf16.msra.mxu0 %v3969_v34  ;;  %3001 = vmatpush1.bf16.msra.mxu1 %v3990_v55 }
 0x729   : > { %2971 = vmatprep.subr.bf16.mxu0 %v3973_v35  ;;  %3003 = vmatprep.subr.bf16.mxu1 %v3993_v57 }
 0x72c   : > { %2973 = vmatpush1.bf16.msra.mxu0 %v3984_v50  ;;  %3005 = vmatpush1.bf16.msra.mxu1 %v4005_v6 }
 0x72d   : > { %2975 = vmatprep.subr.bf16.mxu0 %v3988_v52  ;;  %3007 = vmatprep.subr.bf16.mxu1 %v4008_v13 }
 0x730   : > { %2977 = vmatpush1.bf16.msra.mxu0 %v3999_v4  ;;  %3009 = vmatpush1.bf16.msra.mxu1 %v4018_v23 }
 0x731   : > { %2979 = vmatprep.subr.bf16.mxu0 %v4003_v5  ;;  %3011 = vmatprep.subr.bf16.mxu1 %v4021_v24 }
 0x734   : > { %2981 = vmatpush1.bf16.msra.mxu0 %v4014_v20  ;;  %3013 = vmatpush1.bf16.msra.mxu1 %v4027_v29 }
 0x7ea   : > { %v1931_v9 = vpop.f32.mrb[2].mxu0  ;;  %v2002_v46 = vpop.f32.mrb[2].mxu1 }
 0x7eb   : > { %v3016_v47 = vadd.f32 %v1931_v9, %v4068_v40  ;;  %v1933_v58 = vpop.f32.mrb[3].mxu0  ;;  %v2004_v59 = vpop.f32.mrb[3].mxu1  ;;  %v3032_v15 = vadd.f32 %v2002_v46, %v4077_v2 }
 0x7ec   : > { %v3017_v62 = vadd.f32 %v1933_v58, %v4070_v41  ;;  %v3033_v8 = vadd.f32 %v2004_v59, %v4074_v60 }
 0x7ed   : > { %v2421_v1 = vmul.f32 -1.442695, %v3016_v47 }
 0x7ee   : > { %v2422_v7 = vmul.f32 -1.442695, %v3017_v62  ;;  %v2423_v12 = vmul.f32 -1.442695, %v3033_v8 }
 0x7ef   : > { %3285 = vpow2.f32 %v2421_v1 }
 0x7f0   : > { %3287 = vpow2.f32 %v2422_v7 }
 0x7f1   : > { %3289 = vpow2.f32 %v2423_v12 }
 0x7f2   : > { %3291 = vtanh.f32 %v3032_v15 }
 0x7f9   : > { %v3286_v21 = vpop.eup %3285 }
 0x7fa   : > { %v3288_v22 = vpop.eup %3287  ;;  %v2014_v25 = vadd.f32 1.0, %v3286_v21 }
 0x7fb   : > { %v2020_v28 = vadd.f32 1.0, %v3288_v22  ;;  %v3290_v34 = vpop.eup %3289 }
 0x7fc   : > { %3293 = vrcp.f32 %v2014_v25  ;;  %v3292_v35 = vpop.eup %3291  ;;  %v2027_v52 = vadd.f32 1.0, %v3290_v34 }
 0x7fd   : > { %3295 = vrcp.f32 %v2020_v28 }
 0x7fe   : > { %3297 = vrcp.f32 %v2027_v52 }
 0x806   : > { %v3294_v39 = vpop.eup %3293 }
 0x807   : > { %v3296_v42 = vpop.eup %3295  ;;  %v2031_v50 = vmul.f32 %v3294_v39, %v3292_v35 }
 0x808   : > { %v2030_v55 = vmul.f32 %v3296_v42, %v4295_v19  ;;  %v3298_v4 = vpop.eup %3297 }
 0x80a   : > { %v2032_v57 = vadd.f32 %v2031_v50, %v2030_v55 }
 0x80c   : > { %3299 = vtanh.f32 %v2032_v57 }
 0x816   : > { %v3300_v5 = vpop.eup %3299 }
 0x817   : > { %v2034_v6 = vmul.f32 %v3300_v5, %v3298_v4 }
 0x819   : > { %2424 = vst [vmem:[%s3906_s8 + $0x8] sm:$0xff] %v2034_v6  ;;  %2106 = vmatmul.mubr.f32.vlgmr.msra.gmra.mrb[0].mxu0 %v2034_v6  ;;  %2177 = vmatmul.mubr.f32.vlgmr.msra.gmra.mrb[0].mxu1 %v2034_v6 }
 0x8ec   : > { %v2107_v13 = vpop.f32.mrb[0].mxu0  ;;  %v2178_v20 = vpop.f32.mrb[0].mxu1 }
 0x8ed   : > { %v3014_v23 = vadd.f32 %v2107_v13, %v4068_v40  ;;  %v2109_v24 = vpop.f32.mrb[1].mxu0  ;;  %v2180_v29 = vpop.f32.mrb[1].mxu1  ;;  %v3030_v33 = vadd.f32 %v2178_v20, %v4077_v2 }
 0x8ee   : > { %v3015_v30 = vadd.f32 %v2109_v24, %v4070_v41  ;;  %v3031_v31 = vadd.f32 %v2180_v29, %v4074_v60 }
 0x8ef   : > { %v2425_v43 = vmul.f32 -1.442695, %v3014_v23 }
 0x8f0   : > { %v2426_v44 = vmul.f32 -1.442695, %v3015_v30  ;;  %v2427_v32 = vmul.f32 -1.442695, %v3031_v31 }
 0x8f1   : > { %3301 = vpow2.f32 %v2425_v43 }
 0x8f2   : > { %3303 = vpow2.f32 %v2426_v44 }
 0x8f3   : > { %3305 = vpow2.f32 %v2427_v32 }
 0x8f4   : > { %3307 = vtanh.f32 %v3030_v33 }
 0x8fb   : > { %v3302_v36 = vpop.eup %3301 }
 0x8fc   : > { %v3304_v45 = vpop.eup %3303  ;;  %v2190_v48 = vadd.f32 1.0, %v3302_v36 }
 0x8fd   : > { %v2196_v49 = vadd.f32 1.0, %v3304_v45  ;;  %v3306_v40 = vpop.eup %3305 }
 0x8fe   : > { %3309 = vrcp.f32 %v2190_v48  ;;  %v3308_v41 = vpop.eup %3307  ;;  %v2203_v61 = vadd.f32 1.0, %v3306_v40 }
 0x8ff   : > { %3311 = vrcp.f32 %v2196_v49 }
 0x900   : > { %3313 = vrcp.f32 %v2203_v61 }
 0x908   : > { %v3310_v53 = vpop.eup %3309 }
 0x909   : > { %v3312_v54 = vpop.eup %3311  ;;  %v2207_v56 = vmul.f32 %v3310_v53, %v3308_v41 }
 0x90a   : > { %v2206_v37 = vmul.f32 %v3312_v54, %v2032_v57  ;;  %v3314_v2 = vpop.eup %3313 }
 0x90c   : > { %v2208_v60 = vadd.f32 %v2207_v56, %v2206_v37 }
 0x90e   : > { %3315 = vtanh.f32 %v2208_v60  ;;  %2213 = vst [vmem:[#allocation3] sm:$0xff] %v2208_v60  ;;  %2218 = vst [vmem:[#allocation17] sm:$0xff] (!%p2428_p13), %v2208_v60 }
 0x915   : > { %2217 = sbr.rel (%p2428_p13) target bundleno = 2332 (0x91c), region = 76 }
 0x918   : > { %v3316_v63 = vpop.eup %3315 }
 0x919   : > { %v2210_v51 = vmul.f32 %v3316_v63, %v3314_v2 }
 0x91b   : > { %2211 = vst [vmem:[%s3906_s8] sm:$0xff] %v2210_v51  ;;  %2212 = vst [vmem:[#allocation2] sm:$0xff] %v2210_v51 }
 0x91c PF: > { %s2227_s9 = ssub.s32 1, %s3673_s30  ;;  %s2234_s13 = sshll.u32 %s3906_s8, 4  ;;  %s4350_s13 = int_to_ptr.vmem [resolvable:$true] %s2234_s13 }
 0x91d   : > { %s2437_s20 = sshll.u32 %s2227_s9, 10  ;;  %s2220_s16 = scalar_lea.sflag [#allocation7], %s3884_s10 }
 0x91e   : > { %s4348_s22 = scalar_lea.hbm %s4422_s6, %s2437_s20  ;;  %s3487_s29 = scalar_lea.vmem %s4350_s13, 1024 }
 0x91f   : > { %p3488_p6 = scmp.ne.s32.totalorder %s4350_s13, %s3487_s29  ;;  %p4444_p8 = scmp.ne.s32.totalorder %s4433_s12, 0 }
 0x920   : > { %s3608_s17 = smov [#allocation16]  }
 0x921   : > { %p3489_p3 = pnand %p3488_p6, %p4444_p8  ;;  %s3491_s18 = sshll.u32 %s3608_s17, 4  ;;  %s3492_s18 = int_to_ptr.vmem [resolvable:$false] %s3491_s18 }
 0x922   : > { %s3493_s14 = scalar_lea.vmem %s3492_s18, 2048  ;;  %p3494_p5 = scmp.lt.s32.totalorder %s4350_s13, %s3492_s18 }
 0x923   : > { %p3490_p4 = pneg %p3489_p3  ;;  %p3495_p1 = scmp.lt.s32.totalorder %s3493_s14, %s3487_s29 }
 0x925   : > { %p3496_p11 = por %p3495_p1, %p3494_p5 }
 0x927   : > { %p3497_p0 = pnand %p3496_p11, %p3490_p4 }
 0x929   : > { %3500 = shalt.err (!%p3497_p0)
}
 0x92a   : > { %s3501_s21 = scalar_lea.hbm %s4348_s22, 1024  ;;  %s3505_s20 = scalar_lea.hbm %s4422_s6, 2048 }
 0x92b   : > { %p3502_p2 = scmp.ne.s32.totalorder %s4348_s22, %s3501_s21  ;;  %p3506_p12 = scmp.lt.u32.totalorder %s4348_s22, %s4422_s6 }
 0x92c   : > { %p3507_p7 = scmp.lt.u32.totalorder %s3505_s20, %s3501_s21  ;;  %p3509_p6 = scmp.lt.u32.totalorder %s3501_s21, %s4348_s22 }
 0x92d   : > { %p3503_p9 = pnand %p3502_p2, %p4444_p8 }
 0x92e   : > { %p3508_p13 = por %p3507_p7, %p3506_p12 }
 0x92f   : > { %p3504_p10 = pneg %p3503_p9 }
 0x930   : > { %p3510_p3 = por %p3509_p6, %p3508_p13 }
 0x932   : > { %p3511_p4 = pnand %p3510_p3, %p3504_p10 }
 0x934   : > { %3514 = shalt.err (!%p3511_p4)
}
 0x935   : > { %s3609_s29 = smov 128   ;;  %s3610_s17 = smov 8  }
 0x936   : > { %3100 = dma.vmem_to_hbm [thread:$0]  (%p4444_p8), %s4350_s13, 1024, %s4348_s22, %s2220_s16, %s3609_s29, %s3609_s29, %s3610_s17  }
 0x937   : > { %s3611_s18 = smov [#allocation17]   ;;  %p4445_p1 = scmp.eq.s32.totalorder %s3673_s30, 1 }
 0x938   : > { %s2248_s14 = sshll.u32 %s3611_s18, 4  ;;  %s2249_s14 = int_to_ptr.vmem [resolvable:$true] %s2248_s14 }
 0x939   : > { %s3515_s8 = scalar_lea.vmem %s2249_s14, 128  ;;  %p3522_p2 = scmp.lt.s32.totalorder %s2249_s14, %s2249_s14 }
 0x93a   : > { %p3516_p5 = scmp.ne.s32.totalorder %s2249_s14, %s3515_s8  ;;  %p3523_p9 = scmp.lt.s32.totalorder %s3515_s8, %s3515_s8 }
 0x93c   : > { %p3517_p11 = pnand %p3516_p5, %p4445_p1  ;;  %p3524_p10 = por %p3523_p9, %p3522_p2 }
 0x93e   : > { %p3518_p0 = pneg %p3517_p11 }
 0x940   : > { %p3525_p12 = pnand %p3524_p10, %p3518_p0 }
 0x942   : > { %3528 = shalt.err (!%p3525_p12)
}
 0x943   : > { %s3529_s12 = scalar_lea.hbm %s4423_s7, 128  ;;  %p4446_p7 = pmov %p4445_p1 }
 0x944   : > { %p3530_p8 = scmp.ne.s32.totalorder %s4423_s7, %s3529_s12  ;;  %p3535_p3 = scmp.lt.u32.totalorder %s3529_s12, %s4423_s7 }
 0x946   : > { %p3531_p13 = pnand %p3530_p8, %p4446_p7 }
 0x948   : > { %p3532_p6 = pneg %p3531_p13 }
 0x94a   : > { %p3537_p4 = pnand %p3535_p3, %p3532_p6 }
 0x94c   : > { %3540 = shalt.err (!%p3537_p4)
}
 0x94d   : > { %p4447_p5 = pmov %p4445_p1 }
 0x94f   : > { %3102 = dma.vmem_to_hbm [thread:$0]  (%p4447_p5), %s2249_s14, 128, %s4423_s7, [#allocation18]  }
 0x950   : > { %3574 = dma.done.wait (%p4445_p1), [#allocation18], 128   ;;  %p4448_p11 = pmov %p4445_p1 }
 0x952   : > { %3576 = vsyncadd (%p4448_p11), [#allocation18], 4294967168 }
 0x953 PF: > { %s2264_s23 = sand.u32 1, %s3583_s24   ;;  %p4449_p0 = scmp.ne.s32.totalorder %s4434_s15, 0 }
 0x954   : > { %p4450_p2 = scmp.ge.s32.totalorder %s3595_s27, 2  ;;  %s2265_s29 = scalar_lea.sflag [#allocation7], %s2264_s23 }
 0x956   : > { %p3127_p9 = pnand %p4450_p2, %p4449_p0 }
 0x958   : > { %3578 = dma.done.wait (!%p3127_p9), %s2265_s29, 1024  }
 0x959   : > { %3580 = vsyncadd (!%p3127_p9), %s2265_s29, 4294966272  ;;  %p25_p10 = scmp.ge.s32.totalorder %s3810_s11, 4   ;;  %s4451_s24 = smov %s3587_s25 }
 0x95a   : > { %s4452_s25 = smov %s3591_s26  ;;  %s4453_s26 = smov %s3822_s28 }
 0x95b   : > { %s4454_s27 = smov %s3810_s11  ;;  %27 = sbr.rel (!%p25_p10) target bundleno = 9 (0x9), region = 139 }
 0x962   :  { %2270 = vsyncpa [#allocation6], 1 }
 0x963   :  { %2272 = vsyncpa [#allocation6 + $0x1], 1 }
 0x964   :  { %2273 = vsyncpa [#allocation9], 1 }
 0x965   :  { %2274 = vsyncpa [#allocation12], 1 }
 0x966   :  { %2275 = vsyncpa [#allocation15], 1 }
 0x967   :  { %2276 = vsyncpa [#allocation7], 1 }
 0x968   :  { %2278 = vsyncpa [#allocation7 + $0x1], 1 }
 0x969   :  { %2279 = vsyncpa [#allocation18], 1 }

</bundles_post_ra>
